<compile_context>
chip_gen: v7x
topology: tpu7x:2x2x1
jax: 0.10.0
libtpu: 0.0.40
codegen_flags: <defaults>
</compile_context>

<pallas_src>
import jax
import jax.numpy as jnp
from jax.experimental import pallas as pl
from jax.experimental.pallas import tpu as pltpu


def _round_up(x, m):
    return ((x + m - 1) // m) * m


def _make_mixprop_kernel(c_in, c_out, gdep, alpha, lb):
    alpha = float(alpha)

    def kernel(x_ref, a_ref, w_ref, b_ref, o_ref):
        # x_ref: (c_in, Vp, lb) VMEM      a_ref: (Vp, Vp) VMEM
        # w_ref: (c_out, (gdep+1)*c_in) SMEM   b_ref: (c_out,) SMEM
        # o_ref: (c_out, Vp, lb) VMEM
        a = a_ref[...].astype(jnp.float32)

        # Wide working slab (Vp, c_in*lb): lane-axis concat of the per-channel
        # (Vp, lb) planes (lb is a multiple of 128, so this is tile-aligned).
        # Every hop is then ONE (Vp, Vp) @ (Vp, c_in*lb) MXU matmul.
        if c_in == 1:
            x_wide = x_ref[0, :, :].astype(jnp.float32)
        else:
            x_wide = jnp.concatenate(
                [x_ref[c, :, :] for c in range(c_in)], axis=1
            ).astype(jnp.float32)

        # Per-output-channel f32 accumulators, seeded with the hop-0 (identity)
        # contribution of the 1x1 conv. Bias is added at store time.
        accs = []
        for o in range(c_out):
            acc = w_ref[o, 0] * x_wide[:, 0:lb]
            for c in range(1, c_in):
                acc = acc + w_ref[o, c] * x_wide[:, c * lb:(c + 1) * lb]
            accs.append(acc)

        # Mix-hop recursion; only x_wide, h and the accumulators stay live.
        h = x_wide
        for i in range(1, gdep + 1):
            h = alpha * x_wide + (1.0 - alpha) * jnp.dot(
                a, h, preferred_element_type=jnp.float32
            )
            for o in range(c_out):
                acc = accs[o]
                for c in range(c_in):
                    acc = acc + w_ref[o, i * c_in + c] * h[:, c * lb:(c + 1) * lb]
                accs[o] = acc

        # One unmasked full-plane store per output channel (Vp % 8 == 0,
        # lb % 128 == 0 -> lane/sublane dense).
        for o in range(c_out):
            o_ref[o, :, :] = (accs[o] + b_ref[o]).astype(o_ref.dtype)

    return kernel


def mixprop_forward(x, adj, weight, bias, *, gdep, alpha, l_block=None,
                    vmem_budget_bytes=36 * 1024 * 1024):
    """x: (N, C, V, L), adj: (V, V), weight: (c_out, (gdep+1)*C), bias: (c_out,)
    -> (N, c_out, V, L), matching mixprop.forward."""
    N, C, V, L = x.shape
    c_out, K = weight.shape
    assert K == (gdep + 1) * C, "weight does not match (gdep+1)*c_in"
    assert adj.shape == (V, V)
    assert bias.shape == (c_out,)

    # Row-normalised adjacency with self loops (tiny (V, V) op, f32, done once).
    adj_i = adj.astype(jnp.float32) + jnp.eye(V, dtype=jnp.float32)
    a = adj_i / jnp.sum(adj_i, axis=1, keepdims=True)

    # Pad V to a sublane multiple and L to a lane multiple of 128 so every
    # block is (8,128)-aligned. Padded rows/cols of `a` and `x` are zero, so
    # padded nodes/timesteps never contaminate real ones; the padded output is
    # sliced away at the end.
    Vp = max(8, _round_up(V, 8))
    Lp = max(128, _round_up(L, 128))
    a_p = jnp.zeros((Vp, Vp), jnp.float32).at[:V, :V].set(a)
    x_p = jnp.zeros((N, C, Vp, Lp), x.dtype).at[:, :, :V, :L].set(x)
    w_f = weight.astype(jnp.float32)
    b_f = bias.astype(jnp.float32)

    itemsize = jnp.dtype(x.dtype).itemsize

    def vmem_need(lb):
        blocks = 2 * (C + c_out) * Vp * lb * itemsize   # double-buffered in/out blocks
        live = (3 * C + c_out + 2) * Vp * lb * 4        # f32 working slabs in the body
        return blocks + live + Vp * Vp * 4

    if l_block is None:
        m = Lp // 128
        cands = sorted({128 * d for d in range(1, m + 1) if m % d == 0},
                       reverse=True)
        l_block = cands[-1]                 # smallest (=128) as fallback
        for cand in cands:                  # largest tile that fits the budget
            if vmem_need(cand) <= vmem_budget_bytes:
                l_block = cand
                break
        # Keep both v7x TensorCores busy: prefer >= 2 grid steps when possible.
        if N * (Lp // l_block) < 2:
            for cand in cands:
                if cand < l_block and N * (Lp // cand) >= 2:
                    l_block = cand
                    break
    assert Lp % l_block == 0 and l_block % 128 == 0
    grid = (N, Lp // l_block)

    # Above the v5e (16 MiB) / v6e,v7x (32 MiB) scoped defaults, below v7x's
    # 64 MiB physical VMEM for the budgeted tile sizes.
    vmem_limit = int(min(100 * 1024 * 1024,
                         max(48 * 1024 * 1024, (3 * vmem_need(l_block)) // 2)))

    flops = 2 * N * Lp * (gdep * C * Vp * Vp + (gdep + 1) * C * c_out * Vp)
    bytes_accessed = (x_p.size * itemsize + a_p.size * 4 + w_f.size * 4
                      + b_f.size * 4 + N * c_out * Vp * Lp * itemsize)

    kernel = _make_mixprop_kernel(C, c_out, gdep, alpha, l_block)

    out_p = pl.pallas_call(
        kernel,
        out_shape=jax.ShapeDtypeStruct((N, c_out, Vp, Lp), x.dtype),
        grid=grid,
        in_specs=[
            pl.BlockSpec((None, C, Vp, l_block), lambda n, t: (n, 0, 0, t)),
            pl.BlockSpec((Vp, Vp), lambda n, t: (0, 0)),
            pl.BlockSpec(memory_space=pltpu.MemorySpace.SMEM),  # weight (scalars)
            pl.BlockSpec(memory_space=pltpu.MemorySpace.SMEM),  # bias   (scalars)
        ],
        out_specs=pl.BlockSpec((None, c_out, Vp, l_block),
                               lambda n, t: (n, 0, 0, t)),
        compiler_params=pltpu.CompilerParams(
            dimension_semantics=("parallel", "parallel"),
            vmem_limit_bytes=vmem_limit,
        ),
        cost_estimate=pl.CostEstimate(
            flops=flops, transcendentals=0, bytes_accessed=bytes_accessed),
    )(x_p, a_p, w_f, b_f)

    # Drop the V / L padding.
    return out_p[:, :, :V, :L]


def mixprop_reference(x, adj, weight, bias, *, gdep, alpha):
    """Plain-JAX replica of the PyTorch forward (high precision, for checking)."""
    V = adj.shape[0]
    adj_i = adj + jnp.eye(V, dtype=adj.dtype)
    a = adj_i / jnp.sum(adj_i, axis=1, keepdims=True)
    h = x
    outs = [h]
    for _ in range(gdep):
        prop = jnp.einsum("ncwl,vw->ncvl", h, a, precision=jax.lax.Precision.HIGHEST)
        h = alpha * x + (1.0 - alpha) * prop
        outs.append(h)
    ho = jnp.concatenate(outs, axis=1)
    out = jnp.einsum("nkvl,ok->novl", ho, weight, precision=jax.lax.Precision.HIGHEST)
    return out + bias[None, :, None, None]


if __name__ == "__main__":
    # Small shapes consistent with mixprop's forward:
    #   x: (batch, c_in, num_nodes, seq_len), adj: (num_nodes, num_nodes)
    N, C_IN, V, L = 2, 4, 16, 8
    GDEP, C_OUT, ALPHA = 2, 8, 0.05

    key = jax.random.PRNGKey(0)
    kx, ka, kw, kb = jax.random.split(key, 4)
    x = jax.random.normal(kx, (N, C_IN, V, L), dtype=jnp.float32)
    adj = jax.random.uniform(ka, (V, V), dtype=jnp.float32)  # non-negative edge weights
    weight = 0.1 * jax.random.normal(kw, (C_OUT, (GDEP + 1) * C_IN), dtype=jnp.float32)
    bias = 0.1 * jax.random.normal(kb, (C_OUT,), dtype=jnp.float32)

    out = mixprop_forward(x, adj, weight, bias, gdep=GDEP, alpha=ALPHA)
    out = jax.block_until_ready(out)

    ref = mixprop_reference(x, adj, weight, bias, gdep=GDEP, alpha=ALPHA)
    assert out.shape == (N, C_OUT, V, L)
    err = float(jnp.max(jnp.abs(out - ref)))
    assert err < 2e-3, f"max abs error {err}"

    print("KERNEL_OK")
</pallas_src>

<mosaic_0001>
module attributes {stable_mosaic.version = 11 : i64} {
  func.func @kernel(%arg0: i32, %arg1: i32, %arg2: memref<1x4x16x128xf32, #tpu.memory_space<vmem>>, %arg3: memref<16x16xf32, #tpu.memory_space<vmem>>, %arg4: memref<8x12xf32, #tpu.memory_space<smem>>, %arg5: memref<8xf32, #tpu.memory_space<smem>>, %arg6: memref<1x8x16x128xf32, #tpu.memory_space<vmem>>) attributes {dimension_semantics = [#tpu.dimension_semantics<parallel>, #tpu.dimension_semantics<parallel>], iteration_bounds = array<i64: 2, 1>, scalar_prefetch = 0 : i64, scratch_operands = 0 : i64, tpu.core_type = #tpu.core_type<tc>, window_params = [{transform_indices = @transform_0, window_bounds = array<i64: 1, 4, 16, 128>}, {pipeline_mode = #tpu.pipeline_mode<synchronous>, transform_indices = @transform_1, window_bounds = array<i64: 16, 16>}, {transform_indices = @transform_2, window_bounds = array<i64: 8, 12>}, {transform_indices = @transform_3, window_bounds = array<i64: 8>}, {transform_indices = @transform_4, window_bounds = array<i64: 1, 8, 16, 128>}]} {
    %c0 = arith.constant 0 : index
    %c0_0 = arith.constant 0 : index
    %0 = vector.load %arg3[%c0, %c0_0] : memref<16x16xf32, #tpu.memory_space<vmem>>, vector<16x16xf32>
    %c0_1 = arith.constant 0 : index
    %c0_2 = arith.constant 0 : index
    %c0_3 = arith.constant 0 : index
    %c0_4 = arith.constant 0 : index
    %1 = vector.load %arg2[%c0_1, %c0_2, %c0_3, %c0_4] : memref<1x4x16x128xf32, #tpu.memory_space<vmem>>, vector<1x1x16x128xf32>
    %2 = vector.shape_cast %1 : vector<1x1x16x128xf32> to vector<16x128xf32>
    %c0_5 = arith.constant 0 : index
    %c1 = arith.constant 1 : index
    %c0_6 = arith.constant 0 : index
    %c0_7 = arith.constant 0 : index
    %3 = vector.load %arg2[%c0_5, %c1, %c0_6, %c0_7] : memref<1x4x16x128xf32, #tpu.memory_space<vmem>>, vector<1x1x16x128xf32>
    %4 = vector.shape_cast %3 : vector<1x1x16x128xf32> to vector<16x128xf32>
    %c0_8 = arith.constant 0 : index
    %c2 = arith.constant 2 : index
    %c0_9 = arith.constant 0 : index
    %c0_10 = arith.constant 0 : index
    %5 = vector.load %arg2[%c0_8, %c2, %c0_9, %c0_10] : memref<1x4x16x128xf32, #tpu.memory_space<vmem>>, vector<1x1x16x128xf32>
    %6 = vector.shape_cast %5 : vector<1x1x16x128xf32> to vector<16x128xf32>
    %c0_11 = arith.constant 0 : index
    %c3 = arith.constant 3 : index
    %c0_12 = arith.constant 0 : index
    %c0_13 = arith.constant 0 : index
    %7 = vector.load %arg2[%c0_11, %c3, %c0_12, %c0_13] : memref<1x4x16x128xf32, #tpu.memory_space<vmem>>, vector<1x1x16x128xf32>
    %8 = vector.shape_cast %7 : vector<1x1x16x128xf32> to vector<16x128xf32>
    %9 = tpu.concatenate %2, %4, %6, %8 in 1 : vector<16x128xf32>, vector<16x128xf32>, vector<16x128xf32>, vector<16x128xf32> -> vector<16x512xf32>
    %c0_14 = arith.constant 0 : index
    %c0_15 = arith.constant 0 : index
    %10 = memref.load %arg4[%c0_14, %c0_15] : memref<8x12xf32, #tpu.memory_space<smem>>
    %11 = vector.extract_strided_slice %9 {offsets = [0, 0], sizes = [16, 128], strides = [1, 1]} : vector<16x512xf32> to vector<16x128xf32>
    %12 = vector.broadcast %10 : f32 to vector<16x128xf32>
    %13 = arith.mulf %12, %11 : vector<16x128xf32>
    %c0_16 = arith.constant 0 : index
    %c1_17 = arith.constant 1 : index
    %14 = memref.load %arg4[%c0_16, %c1_17] : memref<8x12xf32, #tpu.memory_space<smem>>
    %15 = vector.extract_strided_slice %9 {offsets = [0, 128], sizes = [16, 128], strides = [1, 1]} : vector<16x512xf32> to vector<16x128xf32>
    %16 = vector.broadcast %14 : f32 to vector<16x128xf32>
    %17 = arith.mulf %16, %15 : vector<16x128xf32>
    %18 = arith.addf %13, %17 : vector<16x128xf32>
    %c0_18 = arith.constant 0 : index
    %c2_19 = arith.constant 2 : index
    %19 = memref.load %arg4[%c0_18, %c2_19] : memref<8x12xf32, #tpu.memory_space<smem>>
    %20 = vector.extract_strided_slice %9 {offsets = [0, 256], sizes = [16, 128], strides = [1, 1]} : vector<16x512xf32> to vector<16x128xf32>
    %21 = vector.broadcast %19 : f32 to vector<16x128xf32>
    %22 = arith.mulf %21, %20 : vector<16x128xf32>
    %23 = arith.addf %18, %22 : vector<16x128xf32>
    %c0_20 = arith.constant 0 : index
    %c3_21 = arith.constant 3 : index
    %24 = memref.load %arg4[%c0_20, %c3_21] : memref<8x12xf32, #tpu.memory_space<smem>>
    %25 = vector.extract_strided_slice %9 {offsets = [0, 384], sizes = [16, 128], strides = [1, 1]} : vector<16x512xf32> to vector<16x128xf32>
    %26 = vector.broadcast %24 : f32 to vector<16x128xf32>
    %27 = arith.mulf %26, %25 : vector<16x128xf32>
    %28 = arith.addf %23, %27 : vector<16x128xf32>
    %c1_22 = arith.constant 1 : index
    %c0_23 = arith.constant 0 : index
    %29 = memref.load %arg4[%c1_22, %c0_23] : memref<8x12xf32, #tpu.memory_space<smem>>
    %30 = vector.extract_strided_slice %9 {offsets = [0, 0], sizes = [16, 128], strides = [1, 1]} : vector<16x512xf32> to vector<16x128xf32>
    %31 = vector.broadcast %29 : f32 to vector<16x128xf32>
    %32 = arith.mulf %31, %30 : vector<16x128xf32>
    %c1_24 = arith.constant 1 : index
    %c1_25 = arith.constant 1 : index
    %33 = memref.load %arg4[%c1_24, %c1_25] : memref<8x12xf32, #tpu.memory_space<smem>>
    %34 = vector.extract_strided_slice %9 {offsets = [0, 128], sizes = [16, 128], strides = [1, 1]} : vector<16x512xf32> to vector<16x128xf32>
    %35 = vector.broadcast %33 : f32 to vector<16x128xf32>
    %36 = arith.mulf %35, %34 : vector<16x128xf32>
    %37 = arith.addf %32, %36 : vector<16x128xf32>
    %c1_26 = arith.constant 1 : index
    %c2_27 = arith.constant 2 : index
    %38 = memref.load %arg4[%c1_26, %c2_27] : memref<8x12xf32, #tpu.memory_space<smem>>
    %39 = vector.extract_strided_slice %9 {offsets = [0, 256], sizes = [16, 128], strides = [1, 1]} : vector<16x512xf32> to vector<16x128xf32>
    %40 = vector.broadcast %38 : f32 to vector<16x128xf32>
    %41 = arith.mulf %40, %39 : vector<16x128xf32>
    %42 = arith.addf %37, %41 : vector<16x128xf32>
    %c1_28 = arith.constant 1 : index
    %c3_29 = arith.constant 3 : index
    %43 = memref.load %arg4[%c1_28, %c3_29] : memref<8x12xf32, #tpu.memory_space<smem>>
    %44 = vector.extract_strided_slice %9 {offsets = [0, 384], sizes = [16, 128], strides = [1, 1]} : vector<16x512xf32> to vector<16x128xf32>
    %45 = vector.broadcast %43 : f32 to vector<16x128xf32>
    %46 = arith.mulf %45, %44 : vector<16x128xf32>
    %47 = arith.addf %42, %46 : vector<16x128xf32>
    %c2_30 = arith.constant 2 : index
    %c0_31 = arith.constant 0 : index
    %48 = memref.load %arg4[%c2_30, %c0_31] : memref<8x12xf32, #tpu.memory_space<smem>>
    %49 = vector.extract_strided_slice %9 {offsets = [0, 0], sizes = [16, 128], strides = [1, 1]} : vector<16x512xf32> to vector<16x128xf32>
    %50 = vector.broadcast %48 : f32 to vector<16x128xf32>
    %51 = arith.mulf %50, %49 : vector<16x128xf32>
    %c2_32 = arith.constant 2 : index
    %c1_33 = arith.constant 1 : index
    %52 = memref.load %arg4[%c2_32, %c1_33] : memref<8x12xf32, #tpu.memory_space<smem>>
    %53 = vector.extract_strided_slice %9 {offsets = [0, 128], sizes = [16, 128], strides = [1, 1]} : vector<16x512xf32> to vector<16x128xf32>
    %54 = vector.broadcast %52 : f32 to vector<16x128xf32>
    %55 = arith.mulf %54, %53 : vector<16x128xf32>
    %56 = arith.addf %51, %55 : vector<16x128xf32>
    %c2_34 = arith.constant 2 : index
    %c2_35 = arith.constant 2 : index
    %57 = memref.load %arg4[%c2_34, %c2_35] : memref<8x12xf32, #tpu.memory_space<smem>>
    %58 = vector.extract_strided_slice %9 {offsets = [0, 256], sizes = [16, 128], strides = [1, 1]} : vector<16x512xf32> to vector<16x128xf32>
    %59 = vector.broadcast %57 : f32 to vector<16x128xf32>
    %60 = arith.mulf %59, %58 : vector<16x128xf32>
    %61 = arith.addf %56, %60 : vector<16x128xf32>
    %c2_36 = arith.constant 2 : index
    %c3_37 = arith.constant 3 : index
    %62 = memref.load %arg4[%c2_36, %c3_37] : memref<8x12xf32, #tpu.memory_space<smem>>
    %63 = vector.extract_strided_slice %9 {offsets = [0, 384], sizes = [16, 128], strides = [1, 1]} : vector<16x512xf32> to vector<16x128xf32>
    %64 = vector.broadcast %62 : f32 to vector<16x128xf32>
    %65 = arith.mulf %64, %63 : vector<16x128xf32>
    %66 = arith.addf %61, %65 : vector<16x128xf32>
    %c3_38 = arith.constant 3 : index
    %c0_39 = arith.constant 0 : index
    %67 = memref.load %arg4[%c3_38, %c0_39] : memref<8x12xf32, #tpu.memory_space<smem>>
    %68 = vector.extract_strided_slice %9 {offsets = [0, 0], sizes = [16, 128], strides = [1, 1]} : vector<16x512xf32> to vector<16x128xf32>
    %69 = vector.broadcast %67 : f32 to vector<16x128xf32>
    %70 = arith.mulf %69, %68 : vector<16x128xf32>
    %c3_40 = arith.constant 3 : index
    %c1_41 = arith.constant 1 : index
    %71 = memref.load %arg4[%c3_40, %c1_41] : memref<8x12xf32, #tpu.memory_space<smem>>
    %72 = vector.extract_strided_slice %9 {offsets = [0, 128], sizes = [16, 128], strides = [1, 1]} : vector<16x512xf32> to vector<16x128xf32>
    %73 = vector.broadcast %71 : f32 to vector<16x128xf32>
    %74 = arith.mulf %73, %72 : vector<16x128xf32>
    %75 = arith.addf %70, %74 : vector<16x128xf32>
    %c3_42 = arith.constant 3 : index
    %c2_43 = arith.constant 2 : index
    %76 = memref.load %arg4[%c3_42, %c2_43] : memref<8x12xf32, #tpu.memory_space<smem>>
    %77 = vector.extract_strided_slice %9 {offsets = [0, 256], sizes = [16, 128], strides = [1, 1]} : vector<16x512xf32> to vector<16x128xf32>
    %78 = vector.broadcast %76 : f32 to vector<16x128xf32>
    %79 = arith.mulf %78, %77 : vector<16x128xf32>
    %80 = arith.addf %75, %79 : vector<16x128xf32>
    %c3_44 = arith.constant 3 : index
    %c3_45 = arith.constant 3 : index
    %81 = memref.load %arg4[%c3_44, %c3_45] : memref<8x12xf32, #tpu.memory_space<smem>>
    %82 = vector.extract_strided_slice %9 {offsets = [0, 384], sizes = [16, 128], strides = [1, 1]} : vector<16x512xf32> to vector<16x128xf32>
    %83 = vector.broadcast %81 : f32 to vector<16x128xf32>
    %84 = arith.mulf %83, %82 : vector<16x128xf32>
    %85 = arith.addf %80, %84 : vector<16x128xf32>
    %c4 = arith.constant 4 : index
    %c0_46 = arith.constant 0 : index
    %86 = memref.load %arg4[%c4, %c0_46] : memref<8x12xf32, #tpu.memory_space<smem>>
    %87 = vector.extract_strided_slice %9 {offsets = [0, 0], sizes = [16, 128], strides = [1, 1]} : vector<16x512xf32> to vector<16x128xf32>
    %88 = vector.broadcast %86 : f32 to vector<16x128xf32>
    %89 = arith.mulf %88, %87 : vector<16x128xf32>
    %c4_47 = arith.constant 4 : index
    %c1_48 = arith.constant 1 : index
    %90 = memref.load %arg4[%c4_47, %c1_48] : memref<8x12xf32, #tpu.memory_space<smem>>
    %91 = vector.extract_strided_slice %9 {offsets = [0, 128], sizes = [16, 128], strides = [1, 1]} : vector<16x512xf32> to vector<16x128xf32>
    %92 = vector.broadcast %90 : f32 to vector<16x128xf32>
    %93 = arith.mulf %92, %91 : vector<16x128xf32>
    %94 = arith.addf %89, %93 : vector<16x128xf32>
    %c4_49 = arith.constant 4 : index
    %c2_50 = arith.constant 2 : index
    %95 = memref.load %arg4[%c4_49, %c2_50] : memref<8x12xf32, #tpu.memory_space<smem>>
    %96 = vector.extract_strided_slice %9 {offsets = [0, 256], sizes = [16, 128], strides = [1, 1]} : vector<16x512xf32> to vector<16x128xf32>
    %97 = vector.broadcast %95 : f32 to vector<16x128xf32>
    %98 = arith.mulf %97, %96 : vector<16x128xf32>
    %99 = arith.addf %94, %98 : vector<16x128xf32>
    %c4_51 = arith.constant 4 : index
    %c3_52 = arith.constant 3 : index
    %100 = memref.load %arg4[%c4_51, %c3_52] : memref<8x12xf32, #tpu.memory_space<smem>>
    %101 = vector.extract_strided_slice %9 {offsets = [0, 384], sizes = [16, 128], strides = [1, 1]} : vector<16x512xf32> to vector<16x128xf32>
    %102 = vector.broadcast %100 : f32 to vector<16x128xf32>
    %103 = arith.mulf %102, %101 : vector<16x128xf32>
    %104 = arith.addf %99, %103 : vector<16x128xf32>
    %c5 = arith.constant 5 : index
    %c0_53 = arith.constant 0 : index
    %105 = memref.load %arg4[%c5, %c0_53] : memref<8x12xf32, #tpu.memory_space<smem>>
    %106 = vector.extract_strided_slice %9 {offsets = [0, 0], sizes = [16, 128], strides = [1, 1]} : vector<16x512xf32> to vector<16x128xf32>
    %107 = vector.broadcast %105 : f32 to vector<16x128xf32>
    %108 = arith.mulf %107, %106 : vector<16x128xf32>
    %c5_54 = arith.constant 5 : index
    %c1_55 = arith.constant 1 : index
    %109 = memref.load %arg4[%c5_54, %c1_55] : memref<8x12xf32, #tpu.memory_space<smem>>
    %110 = vector.extract_strided_slice %9 {offsets = [0, 128], sizes = [16, 128], strides = [1, 1]} : vector<16x512xf32> to vector<16x128xf32>
    %111 = vector.broadcast %109 : f32 to vector<16x128xf32>
    %112 = arith.mulf %111, %110 : vector<16x128xf32>
    %113 = arith.addf %108, %112 : vector<16x128xf32>
    %c5_56 = arith.constant 5 : index
    %c2_57 = arith.constant 2 : index
    %114 = memref.load %arg4[%c5_56, %c2_57] : memref<8x12xf32, #tpu.memory_space<smem>>
    %115 = vector.extract_strided_slice %9 {offsets = [0, 256], sizes = [16, 128], strides = [1, 1]} : vector<16x512xf32> to vector<16x128xf32>
    %116 = vector.broadcast %114 : f32 to vector<16x128xf32>
    %117 = arith.mulf %116, %115 : vector<16x128xf32>
    %118 = arith.addf %113, %117 : vector<16x128xf32>
    %c5_58 = arith.constant 5 : index
    %c3_59 = arith.constant 3 : index
    %119 = memref.load %arg4[%c5_58, %c3_59] : memref<8x12xf32, #tpu.memory_space<smem>>
    %120 = vector.extract_strided_slice %9 {offsets = [0, 384], sizes = [16, 128], strides = [1, 1]} : vector<16x512xf32> to vector<16x128xf32>
    %121 = vector.broadcast %119 : f32 to vector<16x128xf32>
    %122 = arith.mulf %121, %120 : vector<16x128xf32>
    %123 = arith.addf %118, %122 : vector<16x128xf32>
    %c6 = arith.constant 6 : index
    %c0_60 = arith.constant 0 : index
    %124 = memref.load %arg4[%c6, %c0_60] : memref<8x12xf32, #tpu.memory_space<smem>>
    %125 = vector.extract_strided_slice %9 {offsets = [0, 0], sizes = [16, 128], strides = [1, 1]} : vector<16x512xf32> to vector<16x128xf32>
    %126 = vector.broadcast %124 : f32 to vector<16x128xf32>
    %127 = arith.mulf %126, %125 : vector<16x128xf32>
    %c6_61 = arith.constant 6 : index
    %c1_62 = arith.constant 1 : index
    %128 = memref.load %arg4[%c6_61, %c1_62] : memref<8x12xf32, #tpu.memory_space<smem>>
    %129 = vector.extract_strided_slice %9 {offsets = [0, 128], sizes = [16, 128], strides = [1, 1]} : vector<16x512xf32> to vector<16x128xf32>
    %130 = vector.broadcast %128 : f32 to vector<16x128xf32>
    %131 = arith.mulf %130, %129 : vector<16x128xf32>
    %132 = arith.addf %127, %131 : vector<16x128xf32>
    %c6_63 = arith.constant 6 : index
    %c2_64 = arith.constant 2 : index
    %133 = memref.load %arg4[%c6_63, %c2_64] : memref<8x12xf32, #tpu.memory_space<smem>>
    %134 = vector.extract_strided_slice %9 {offsets = [0, 256], sizes = [16, 128], strides = [1, 1]} : vector<16x512xf32> to vector<16x128xf32>
    %135 = vector.broadcast %133 : f32 to vector<16x128xf32>
    %136 = arith.mulf %135, %134 : vector<16x128xf32>
    %137 = arith.addf %132, %136 : vector<16x128xf32>
    %c6_65 = arith.constant 6 : index
    %c3_66 = arith.constant 3 : index
    %138 = memref.load %arg4[%c6_65, %c3_66] : memref<8x12xf32, #tpu.memory_space<smem>>
    %139 = vector.extract_strided_slice %9 {offsets = [0, 384], sizes = [16, 128], strides = [1, 1]} : vector<16x512xf32> to vector<16x128xf32>
    %140 = vector.broadcast %138 : f32 to vector<16x128xf32>
    %141 = arith.mulf %140, %139 : vector<16x128xf32>
    %142 = arith.addf %137, %141 : vector<16x128xf32>
    %c7 = arith.constant 7 : index
    %c0_67 = arith.constant 0 : index
    %143 = memref.load %arg4[%c7, %c0_67] : memref<8x12xf32, #tpu.memory_space<smem>>
    %144 = vector.extract_strided_slice %9 {offsets = [0, 0], sizes = [16, 128], strides = [1, 1]} : vector<16x512xf32> to vector<16x128xf32>
    %145 = vector.broadcast %143 : f32 to vector<16x128xf32>
    %146 = arith.mulf %145, %144 : vector<16x128xf32>
    %c7_68 = arith.constant 7 : index
    %c1_69 = arith.constant 1 : index
    %147 = memref.load %arg4[%c7_68, %c1_69] : memref<8x12xf32, #tpu.memory_space<smem>>
    %148 = vector.extract_strided_slice %9 {offsets = [0, 128], sizes = [16, 128], strides = [1, 1]} : vector<16x512xf32> to vector<16x128xf32>
    %149 = vector.broadcast %147 : f32 to vector<16x128xf32>
    %150 = arith.mulf %149, %148 : vector<16x128xf32>
    %151 = arith.addf %146, %150 : vector<16x128xf32>
    %c7_70 = arith.constant 7 : index
    %c2_71 = arith.constant 2 : index
    %152 = memref.load %arg4[%c7_70, %c2_71] : memref<8x12xf32, #tpu.memory_space<smem>>
    %153 = vector.extract_strided_slice %9 {offsets = [0, 256], sizes = [16, 128], strides = [1, 1]} : vector<16x512xf32> to vector<16x128xf32>
    %154 = vector.broadcast %152 : f32 to vector<16x128xf32>
    %155 = arith.mulf %154, %153 : vector<16x128xf32>
    %156 = arith.addf %151, %155 : vector<16x128xf32>
    %c7_72 = arith.constant 7 : index
    %c3_73 = arith.constant 3 : index
    %157 = memref.load %arg4[%c7_72, %c3_73] : memref<8x12xf32, #tpu.memory_space<smem>>
    %158 = vector.extract_strided_slice %9 {offsets = [0, 384], sizes = [16, 128], strides = [1, 1]} : vector<16x512xf32> to vector<16x128xf32>
    %159 = vector.broadcast %157 : f32 to vector<16x128xf32>
    %160 = arith.mulf %159, %158 : vector<16x128xf32>
    %161 = arith.addf %156, %160 : vector<16x128xf32>
    %cst = arith.constant 5.000000e-02 : f32
    %162 = vector.broadcast %cst : f32 to vector<16x512xf32>
    %163 = arith.mulf %162, %9 : vector<16x512xf32>
    %cst_74 = arith.constant dense<0.000000e+00> : vector<16x512xf32>
    %164 = tpu.matmul %0, %9, %cst_74 {dimension_numbers = #tpu.dot_dimension_numbers<[1], [0], [0], [1], [0, 0, 1, 1], [], []>} : vector<16x16xf32>, vector<16x512xf32>, vector<16x512xf32> -> vector<16x512xf32>
    %cst_75 = arith.constant 0.949999988 : f32
    %165 = vector.broadcast %cst_75 : f32 to vector<16x512xf32>
    %166 = arith.mulf %165, %164 : vector<16x512xf32>
    %167 = arith.addf %163, %166 : vector<16x512xf32>
    %c0_76 = arith.constant 0 : index
    %c4_77 = arith.constant 4 : index
    %168 = memref.load %arg4[%c0_76, %c4_77] : memref<8x12xf32, #tpu.memory_space<smem>>
    %169 = vector.extract_strided_slice %167 {offsets = [0, 0], sizes = [16, 128], strides = [1, 1]} : vector<16x512xf32> to vector<16x128xf32>
    %170 = vector.broadcast %168 : f32 to vector<16x128xf32>
    %171 = arith.mulf %170, %169 : vector<16x128xf32>
    %172 = arith.addf %28, %171 : vector<16x128xf32>
    %c0_78 = arith.constant 0 : index
    %c5_79 = arith.constant 5 : index
    %173 = memref.load %arg4[%c0_78, %c5_79] : memref<8x12xf32, #tpu.memory_space<smem>>
    %174 = vector.extract_strided_slice %167 {offsets = [0, 128], sizes = [16, 128], strides = [1, 1]} : vector<16x512xf32> to vector<16x128xf32>
    %175 = vector.broadcast %173 : f32 to vector<16x128xf32>
    %176 = arith.mulf %175, %174 : vector<16x128xf32>
    %177 = arith.addf %172, %176 : vector<16x128xf32>
    %c0_80 = arith.constant 0 : index
    %c6_81 = arith.constant 6 : index
    %178 = memref.load %arg4[%c0_80, %c6_81] : memref<8x12xf32, #tpu.memory_space<smem>>
    %179 = vector.extract_strided_slice %167 {offsets = [0, 256], sizes = [16, 128], strides = [1, 1]} : vector<16x512xf32> to vector<16x128xf32>
    %180 = vector.broadcast %178 : f32 to vector<16x128xf32>
    %181 = arith.mulf %180, %179 : vector<16x128xf32>
    %182 = arith.addf %177, %181 : vector<16x128xf32>
    %c0_82 = arith.constant 0 : index
    %c7_83 = arith.constant 7 : index
    %183 = memref.load %arg4[%c0_82, %c7_83] : memref<8x12xf32, #tpu.memory_space<smem>>
    %184 = vector.extract_strided_slice %167 {offsets = [0, 384], sizes = [16, 128], strides = [1, 1]} : vector<16x512xf32> to vector<16x128xf32>
    %185 = vector.broadcast %183 : f32 to vector<16x128xf32>
    %186 = arith.mulf %185, %184 : vector<16x128xf32>
    %187 = arith.addf %182, %186 : vector<16x128xf32>
    %c1_84 = arith.constant 1 : index
    %c4_85 = arith.constant 4 : index
    %188 = memref.load %arg4[%c1_84, %c4_85] : memref<8x12xf32, #tpu.memory_space<smem>>
    %189 = vector.extract_strided_slice %167 {offsets = [0, 0], sizes = [16, 128], strides = [1, 1]} : vector<16x512xf32> to vector<16x128xf32>
    %190 = vector.broadcast %188 : f32 to vector<16x128xf32>
    %191 = arith.mulf %190, %189 : vector<16x128xf32>
    %192 = arith.addf %47, %191 : vector<16x128xf32>
    %c1_86 = arith.constant 1 : index
    %c5_87 = arith.constant 5 : index
    %193 = memref.load %arg4[%c1_86, %c5_87] : memref<8x12xf32, #tpu.memory_space<smem>>
    %194 = vector.extract_strided_slice %167 {offsets = [0, 128], sizes = [16, 128], strides = [1, 1]} : vector<16x512xf32> to vector<16x128xf32>
    %195 = vector.broadcast %193 : f32 to vector<16x128xf32>
    %196 = arith.mulf %195, %194 : vector<16x128xf32>
    %197 = arith.addf %192, %196 : vector<16x128xf32>
    %c1_88 = arith.constant 1 : index
    %c6_89 = arith.constant 6 : index
    %198 = memref.load %arg4[%c1_88, %c6_89] : memref<8x12xf32, #tpu.memory_space<smem>>
    %199 = vector.extract_strided_slice %167 {offsets = [0, 256], sizes = [16, 128], strides = [1, 1]} : vector<16x512xf32> to vector<16x128xf32>
    %200 = vector.broadcast %198 : f32 to vector<16x128xf32>
    %201 = arith.mulf %200, %199 : vector<16x128xf32>
    %202 = arith.addf %197, %201 : vector<16x128xf32>
    %c1_90 = arith.constant 1 : index
    %c7_91 = arith.constant 7 : index
    %203 = memref.load %arg4[%c1_90, %c7_91] : memref<8x12xf32, #tpu.memory_space<smem>>
    %204 = vector.extract_strided_slice %167 {offsets = [0, 384], sizes = [16, 128], strides = [1, 1]} : vector<16x512xf32> to vector<16x128xf32>
    %205 = vector.broadcast %203 : f32 to vector<16x128xf32>
    %206 = arith.mulf %205, %204 : vector<16x128xf32>
    %207 = arith.addf %202, %206 : vector<16x128xf32>
    %c2_92 = arith.constant 2 : index
    %c4_93 = arith.constant 4 : index
    %208 = memref.load %arg4[%c2_92, %c4_93] : memref<8x12xf32, #tpu.memory_space<smem>>
    %209 = vector.extract_strided_slice %167 {offsets = [0, 0], sizes = [16, 128], strides = [1, 1]} : vector<16x512xf32> to vector<16x128xf32>
    %210 = vector.broadcast %208 : f32 to vector<16x128xf32>
    %211 = arith.mulf %210, %209 : vector<16x128xf32>
    %212 = arith.addf %66, %211 : vector<16x128xf32>
    %c2_94 = arith.constant 2 : index
    %c5_95 = arith.constant 5 : index
    %213 = memref.load %arg4[%c2_94, %c5_95] : memref<8x12xf32, #tpu.memory_space<smem>>
    %214 = vector.extract_strided_slice %167 {offsets = [0, 128], sizes = [16, 128], strides = [1, 1]} : vector<16x512xf32> to vector<16x128xf32>
    %215 = vector.broadcast %213 : f32 to vector<16x128xf32>
    %216 = arith.mulf %215, %214 : vector<16x128xf32>
    %217 = arith.addf %212, %216 : vector<16x128xf32>
    %c2_96 = arith.constant 2 : index
    %c6_97 = arith.constant 6 : index
    %218 = memref.load %arg4[%c2_96, %c6_97] : memref<8x12xf32, #tpu.memory_space<smem>>
    %219 = vector.extract_strided_slice %167 {offsets = [0, 256], sizes = [16, 128], strides = [1, 1]} : vector<16x512xf32> to vector<16x128xf32>
    %220 = vector.broadcast %218 : f32 to vector<16x128xf32>
    %221 = arith.mulf %220, %219 : vector<16x128xf32>
    %222 = arith.addf %217, %221 : vector<16x128xf32>
    %c2_98 = arith.constant 2 : index
    %c7_99 = arith.constant 7 : index
    %223 = memref.load %arg4[%c2_98, %c7_99] : memref<8x12xf32, #tpu.memory_space<smem>>
    %224 = vector.extract_strided_slice %167 {offsets = [0, 384], sizes = [16, 128], strides = [1, 1]} : vector<16x512xf32> to vector<16x128xf32>
    %225 = vector.broadcast %223 : f32 to vector<16x128xf32>
    %226 = arith.mulf %225, %224 : vector<16x128xf32>
    %227 = arith.addf %222, %226 : vector<16x128xf32>
    %c3_100 = arith.constant 3 : index
    %c4_101 = arith.constant 4 : index
    %228 = memref.load %arg4[%c3_100, %c4_101] : memref<8x12xf32, #tpu.memory_space<smem>>
    %229 = vector.extract_strided_slice %167 {offsets = [0, 0], sizes = [16, 128], strides = [1, 1]} : vector<16x512xf32> to vector<16x128xf32>
    %230 = vector.broadcast %228 : f32 to vector<16x128xf32>
    %231 = arith.mulf %230, %229 : vector<16x128xf32>
    %232 = arith.addf %85, %231 : vector<16x128xf32>
    %c3_102 = arith.constant 3 : index
    %c5_103 = arith.constant 5 : index
    %233 = memref.load %arg4[%c3_102, %c5_103] : memref<8x12xf32, #tpu.memory_space<smem>>
    %234 = vector.extract_strided_slice %167 {offsets = [0, 128], sizes = [16, 128], strides = [1, 1]} : vector<16x512xf32> to vector<16x128xf32>
    %235 = vector.broadcast %233 : f32 to vector<16x128xf32>
    %236 = arith.mulf %235, %234 : vector<16x128xf32>
    %237 = arith.addf %232, %236 : vector<16x128xf32>
    %c3_104 = arith.constant 3 : index
    %c6_105 = arith.constant 6 : index
    %238 = memref.load %arg4[%c3_104, %c6_105] : memref<8x12xf32, #tpu.memory_space<smem>>
    %239 = vector.extract_strided_slice %167 {offsets = [0, 256], sizes = [16, 128], strides = [1, 1]} : vector<16x512xf32> to vector<16x128xf32>
    %240 = vector.broadcast %238 : f32 to vector<16x128xf32>
    %241 = arith.mulf %240, %239 : vector<16x128xf32>
    %242 = arith.addf %237, %241 : vector<16x128xf32>
    %c3_106 = arith.constant 3 : index
    %c7_107 = arith.constant 7 : index
    %243 = memref.load %arg4[%c3_106, %c7_107] : memref<8x12xf32, #tpu.memory_space<smem>>
    %244 = vector.extract_strided_slice %167 {offsets = [0, 384], sizes = [16, 128], strides = [1, 1]} : vector<16x512xf32> to vector<16x128xf32>
    %245 = vector.broadcast %243 : f32 to vector<16x128xf32>
    %246 = arith.mulf %245, %244 : vector<16x128xf32>
    %247 = arith.addf %242, %246 : vector<16x128xf32>
    %c4_108 = arith.constant 4 : index
    %c4_109 = arith.constant 4 : index
    %248 = memref.load %arg4[%c4_108, %c4_109] : memref<8x12xf32, #tpu.memory_space<smem>>
    %249 = vector.extract_strided_slice %167 {offsets = [0, 0], sizes = [16, 128], strides = [1, 1]} : vector<16x512xf32> to vector<16x128xf32>
    %250 = vector.broadcast %248 : f32 to vector<16x128xf32>
    %251 = arith.mulf %250, %249 : vector<16x128xf32>
    %252 = arith.addf %104, %251 : vector<16x128xf32>
    %c4_110 = arith.constant 4 : index
    %c5_111 = arith.constant 5 : index
    %253 = memref.load %arg4[%c4_110, %c5_111] : memref<8x12xf32, #tpu.memory_space<smem>>
    %254 = vector.extract_strided_slice %167 {offsets = [0, 128], sizes = [16, 128], strides = [1, 1]} : vector<16x512xf32> to vector<16x128xf32>
    %255 = vector.broadcast %253 : f32 to vector<16x128xf32>
    %256 = arith.mulf %255, %254 : vector<16x128xf32>
    %257 = arith.addf %252, %256 : vector<16x128xf32>
    %c4_112 = arith.constant 4 : index
    %c6_113 = arith.constant 6 : index
    %258 = memref.load %arg4[%c4_112, %c6_113] : memref<8x12xf32, #tpu.memory_space<smem>>
    %259 = vector.extract_strided_slice %167 {offsets = [0, 256], sizes = [16, 128], strides = [1, 1]} : vector<16x512xf32> to vector<16x128xf32>
    %260 = vector.broadcast %258 : f32 to vector<16x128xf32>
    %261 = arith.mulf %260, %259 : vector<16x128xf32>
    %262 = arith.addf %257, %261 : vector<16x128xf32>
    %c4_114 = arith.constant 4 : index
    %c7_115 = arith.constant 7 : index
    %263 = memref.load %arg4[%c4_114, %c7_115] : memref<8x12xf32, #tpu.memory_space<smem>>
    %264 = vector.extract_strided_slice %167 {offsets = [0, 384], sizes = [16, 128], strides = [1, 1]} : vector<16x512xf32> to vector<16x128xf32>
    %265 = vector.broadcast %263 : f32 to vector<16x128xf32>
    %266 = arith.mulf %265, %264 : vector<16x128xf32>
    %267 = arith.addf %262, %266 : vector<16x128xf32>
    %c5_116 = arith.constant 5 : index
    %c4_117 = arith.constant 4 : index
    %268 = memref.load %arg4[%c5_116, %c4_117] : memref<8x12xf32, #tpu.memory_space<smem>>
    %269 = vector.extract_strided_slice %167 {offsets = [0, 0], sizes = [16, 128], strides = [1, 1]} : vector<16x512xf32> to vector<16x128xf32>
    %270 = vector.broadcast %268 : f32 to vector<16x128xf32>
    %271 = arith.mulf %270, %269 : vector<16x128xf32>
    %272 = arith.addf %123, %271 : vector<16x128xf32>
    %c5_118 = arith.constant 5 : index
    %c5_119 = arith.constant 5 : index
    %273 = memref.load %arg4[%c5_118, %c5_119] : memref<8x12xf32, #tpu.memory_space<smem>>
    %274 = vector.extract_strided_slice %167 {offsets = [0, 128], sizes = [16, 128], strides = [1, 1]} : vector<16x512xf32> to vector<16x128xf32>
    %275 = vector.broadcast %273 : f32 to vector<16x128xf32>
    %276 = arith.mulf %275, %274 : vector<16x128xf32>
    %277 = arith.addf %272, %276 : vector<16x128xf32>
    %c5_120 = arith.constant 5 : index
    %c6_121 = arith.constant 6 : index
    %278 = memref.load %arg4[%c5_120, %c6_121] : memref<8x12xf32, #tpu.memory_space<smem>>
    %279 = vector.extract_strided_slice %167 {offsets = [0, 256], sizes = [16, 128], strides = [1, 1]} : vector<16x512xf32> to vector<16x128xf32>
    %280 = vector.broadcast %278 : f32 to vector<16x128xf32>
    %281 = arith.mulf %280, %279 : vector<16x128xf32>
    %282 = arith.addf %277, %281 : vector<16x128xf32>
    %c5_122 = arith.constant 5 : index
    %c7_123 = arith.constant 7 : index
    %283 = memref.load %arg4[%c5_122, %c7_123] : memref<8x12xf32, #tpu.memory_space<smem>>
    %284 = vector.extract_strided_slice %167 {offsets = [0, 384], sizes = [16, 128], strides = [1, 1]} : vector<16x512xf32> to vector<16x128xf32>
    %285 = vector.broadcast %283 : f32 to vector<16x128xf32>
    %286 = arith.mulf %285, %284 : vector<16x128xf32>
    %287 = arith.addf %282, %286 : vector<16x128xf32>
    %c6_124 = arith.constant 6 : index
    %c4_125 = arith.constant 4 : index
    %288 = memref.load %arg4[%c6_124, %c4_125] : memref<8x12xf32, #tpu.memory_space<smem>>
    %289 = vector.extract_strided_slice %167 {offsets = [0, 0], sizes = [16, 128], strides = [1, 1]} : vector<16x512xf32> to vector<16x128xf32>
    %290 = vector.broadcast %288 : f32 to vector<16x128xf32>
    %291 = arith.mulf %290, %289 : vector<16x128xf32>
    %292 = arith.addf %142, %291 : vector<16x128xf32>
    %c6_126 = arith.constant 6 : index
    %c5_127 = arith.constant 5 : index
    %293 = memref.load %arg4[%c6_126, %c5_127] : memref<8x12xf32, #tpu.memory_space<smem>>
    %294 = vector.extract_strided_slice %167 {offsets = [0, 128], sizes = [16, 128], strides = [1, 1]} : vector<16x512xf32> to vector<16x128xf32>
    %295 = vector.broadcast %293 : f32 to vector<16x128xf32>
    %296 = arith.mulf %295, %294 : vector<16x128xf32>
    %297 = arith.addf %292, %296 : vector<16x128xf32>
    %c6_128 = arith.constant 6 : index
    %c6_129 = arith.constant 6 : index
    %298 = memref.load %arg4[%c6_128, %c6_129] : memref<8x12xf32, #tpu.memory_space<smem>>
    %299 = vector.extract_strided_slice %167 {offsets = [0, 256], sizes = [16, 128], strides = [1, 1]} : vector<16x512xf32> to vector<16x128xf32>
    %300 = vector.broadcast %298 : f32 to vector<16x128xf32>
    %301 = arith.mulf %300, %299 : vector<16x128xf32>
    %302 = arith.addf %297, %301 : vector<16x128xf32>
    %c6_130 = arith.constant 6 : index
    %c7_131 = arith.constant 7 : index
    %303 = memref.load %arg4[%c6_130, %c7_131] : memref<8x12xf32, #tpu.memory_space<smem>>
    %304 = vector.extract_strided_slice %167 {offsets = [0, 384], sizes = [16, 128], strides = [1, 1]} : vector<16x512xf32> to vector<16x128xf32>
    %305 = vector.broadcast %303 : f32 to vector<16x128xf32>
    %306 = arith.mulf %305, %304 : vector<16x128xf32>
    %307 = arith.addf %302, %306 : vector<16x128xf32>
    %c7_132 = arith.constant 7 : index
    %c4_133 = arith.constant 4 : index
    %308 = memref.load %arg4[%c7_132, %c4_133] : memref<8x12xf32, #tpu.memory_space<smem>>
    %309 = vector.extract_strided_slice %167 {offsets = [0, 0], sizes = [16, 128], strides = [1, 1]} : vector<16x512xf32> to vector<16x128xf32>
    %310 = vector.broadcast %308 : f32 to vector<16x128xf32>
    %311 = arith.mulf %310, %309 : vector<16x128xf32>
    %312 = arith.addf %161, %311 : vector<16x128xf32>
    %c7_134 = arith.constant 7 : index
    %c5_135 = arith.constant 5 : index
    %313 = memref.load %arg4[%c7_134, %c5_135] : memref<8x12xf32, #tpu.memory_space<smem>>
    %314 = vector.extract_strided_slice %167 {offsets = [0, 128], sizes = [16, 128], strides = [1, 1]} : vector<16x512xf32> to vector<16x128xf32>
    %315 = vector.broadcast %313 : f32 to vector<16x128xf32>
    %316 = arith.mulf %315, %314 : vector<16x128xf32>
    %317 = arith.addf %312, %316 : vector<16x128xf32>
    %c7_136 = arith.constant 7 : index
    %c6_137 = arith.constant 6 : index
    %318 = memref.load %arg4[%c7_136, %c6_137] : memref<8x12xf32, #tpu.memory_space<smem>>
    %319 = vector.extract_strided_slice %167 {offsets = [0, 256], sizes = [16, 128], strides = [1, 1]} : vector<16x512xf32> to vector<16x128xf32>
    %320 = vector.broadcast %318 : f32 to vector<16x128xf32>
    %321 = arith.mulf %320, %319 : vector<16x128xf32>
    %322 = arith.addf %317, %321 : vector<16x128xf32>
    %c7_138 = arith.constant 7 : index
    %c7_139 = arith.constant 7 : index
    %323 = memref.load %arg4[%c7_138, %c7_139] : memref<8x12xf32, #tpu.memory_space<smem>>
    %324 = vector.extract_strided_slice %167 {offsets = [0, 384], sizes = [16, 128], strides = [1, 1]} : vector<16x512xf32> to vector<16x128xf32>
    %325 = vector.broadcast %323 : f32 to vector<16x128xf32>
    %326 = arith.mulf %325, %324 : vector<16x128xf32>
    %327 = arith.addf %322, %326 : vector<16x128xf32>
    %cst_140 = arith.constant 5.000000e-02 : f32
    %328 = vector.broadcast %cst_140 : f32 to vector<16x512xf32>
    %329 = arith.mulf %328, %9 : vector<16x512xf32>
    %cst_141 = arith.constant dense<0.000000e+00> : vector<16x512xf32>
    %330 = tpu.matmul %0, %167, %cst_141 {dimension_numbers = #tpu.dot_dimension_numbers<[1], [0], [0], [1], [0, 0, 1, 1], [], []>} : vector<16x16xf32>, vector<16x512xf32>, vector<16x512xf32> -> vector<16x512xf32>
    %cst_142 = arith.constant 0.949999988 : f32
    %331 = vector.broadcast %cst_142 : f32 to vector<16x512xf32>
    %332 = arith.mulf %331, %330 : vector<16x512xf32>
    %333 = arith.addf %329, %332 : vector<16x512xf32>
    %c0_143 = arith.constant 0 : index
    %c8 = arith.constant 8 : index
    %334 = memref.load %arg4[%c0_143, %c8] : memref<8x12xf32, #tpu.memory_space<smem>>
    %335 = vector.extract_strided_slice %333 {offsets = [0, 0], sizes = [16, 128], strides = [1, 1]} : vector<16x512xf32> to vector<16x128xf32>
    %336 = vector.broadcast %334 : f32 to vector<16x128xf32>
    %337 = arith.mulf %336, %335 : vector<16x128xf32>
    %338 = arith.addf %187, %337 : vector<16x128xf32>
    %c0_144 = arith.constant 0 : index
    %c9 = arith.constant 9 : index
    %339 = memref.load %arg4[%c0_144, %c9] : memref<8x12xf32, #tpu.memory_space<smem>>
    %340 = vector.extract_strided_slice %333 {offsets = [0, 128], sizes = [16, 128], strides = [1, 1]} : vector<16x512xf32> to vector<16x128xf32>
    %341 = vector.broadcast %339 : f32 to vector<16x128xf32>
    %342 = arith.mulf %341, %340 : vector<16x128xf32>
    %343 = arith.addf %338, %342 : vector<16x128xf32>
    %c0_145 = arith.constant 0 : index
    %c10 = arith.constant 10 : index
    %344 = memref.load %arg4[%c0_145, %c10] : memref<8x12xf32, #tpu.memory_space<smem>>
    %345 = vector.extract_strided_slice %333 {offsets = [0, 256], sizes = [16, 128], strides = [1, 1]} : vector<16x512xf32> to vector<16x128xf32>
    %346 = vector.broadcast %344 : f32 to vector<16x128xf32>
    %347 = arith.mulf %346, %345 : vector<16x128xf32>
    %348 = arith.addf %343, %347 : vector<16x128xf32>
    %c0_146 = arith.constant 0 : index
    %c11 = arith.constant 11 : index
    %349 = memref.load %arg4[%c0_146, %c11] : memref<8x12xf32, #tpu.memory_space<smem>>
    %350 = vector.extract_strided_slice %333 {offsets = [0, 384], sizes = [16, 128], strides = [1, 1]} : vector<16x512xf32> to vector<16x128xf32>
    %351 = vector.broadcast %349 : f32 to vector<16x128xf32>
    %352 = arith.mulf %351, %350 : vector<16x128xf32>
    %353 = arith.addf %348, %352 : vector<16x128xf32>
    %c1_147 = arith.constant 1 : index
    %c8_148 = arith.constant 8 : index
    %354 = memref.load %arg4[%c1_147, %c8_148] : memref<8x12xf32, #tpu.memory_space<smem>>
    %355 = vector.extract_strided_slice %333 {offsets = [0, 0], sizes = [16, 128], strides = [1, 1]} : vector<16x512xf32> to vector<16x128xf32>
    %356 = vector.broadcast %354 : f32 to vector<16x128xf32>
    %357 = arith.mulf %356, %355 : vector<16x128xf32>
    %358 = arith.addf %207, %357 : vector<16x128xf32>
    %c1_149 = arith.constant 1 : index
    %c9_150 = arith.constant 9 : index
    %359 = memref.load %arg4[%c1_149, %c9_150] : memref<8x12xf32, #tpu.memory_space<smem>>
    %360 = vector.extract_strided_slice %333 {offsets = [0, 128], sizes = [16, 128], strides = [1, 1]} : vector<16x512xf32> to vector<16x128xf32>
    %361 = vector.broadcast %359 : f32 to vector<16x128xf32>
    %362 = arith.mulf %361, %360 : vector<16x128xf32>
    %363 = arith.addf %358, %362 : vector<16x128xf32>
    %c1_151 = arith.constant 1 : index
    %c10_152 = arith.constant 10 : index
    %364 = memref.load %arg4[%c1_151, %c10_152] : memref<8x12xf32, #tpu.memory_space<smem>>
    %365 = vector.extract_strided_slice %333 {offsets = [0, 256], sizes = [16, 128], strides = [1, 1]} : vector<16x512xf32> to vector<16x128xf32>
    %366 = vector.broadcast %364 : f32 to vector<16x128xf32>
    %367 = arith.mulf %366, %365 : vector<16x128xf32>
    %368 = arith.addf %363, %367 : vector<16x128xf32>
    %c1_153 = arith.constant 1 : index
    %c11_154 = arith.constant 11 : index
    %369 = memref.load %arg4[%c1_153, %c11_154] : memref<8x12xf32, #tpu.memory_space<smem>>
    %370 = vector.extract_strided_slice %333 {offsets = [0, 384], sizes = [16, 128], strides = [1, 1]} : vector<16x512xf32> to vector<16x128xf32>
    %371 = vector.broadcast %369 : f32 to vector<16x128xf32>
    %372 = arith.mulf %371, %370 : vector<16x128xf32>
    %373 = arith.addf %368, %372 : vector<16x128xf32>
    %c2_155 = arith.constant 2 : index
    %c8_156 = arith.constant 8 : index
    %374 = memref.load %arg4[%c2_155, %c8_156] : memref<8x12xf32, #tpu.memory_space<smem>>
    %375 = vector.extract_strided_slice %333 {offsets = [0, 0], sizes = [16, 128], strides = [1, 1]} : vector<16x512xf32> to vector<16x128xf32>
    %376 = vector.broadcast %374 : f32 to vector<16x128xf32>
    %377 = arith.mulf %376, %375 : vector<16x128xf32>
    %378 = arith.addf %227, %377 : vector<16x128xf32>
    %c2_157 = arith.constant 2 : index
    %c9_158 = arith.constant 9 : index
    %379 = memref.load %arg4[%c2_157, %c9_158] : memref<8x12xf32, #tpu.memory_space<smem>>
    %380 = vector.extract_strided_slice %333 {offsets = [0, 128], sizes = [16, 128], strides = [1, 1]} : vector<16x512xf32> to vector<16x128xf32>
    %381 = vector.broadcast %379 : f32 to vector<16x128xf32>
    %382 = arith.mulf %381, %380 : vector<16x128xf32>
    %383 = arith.addf %378, %382 : vector<16x128xf32>
    %c2_159 = arith.constant 2 : index
    %c10_160 = arith.constant 10 : index
    %384 = memref.load %arg4[%c2_159, %c10_160] : memref<8x12xf32, #tpu.memory_space<smem>>
    %385 = vector.extract_strided_slice %333 {offsets = [0, 256], sizes = [16, 128], strides = [1, 1]} : vector<16x512xf32> to vector<16x128xf32>
    %386 = vector.broadcast %384 : f32 to vector<16x128xf32>
    %387 = arith.mulf %386, %385 : vector<16x128xf32>
    %388 = arith.addf %383, %387 : vector<16x128xf32>
    %c2_161 = arith.constant 2 : index
    %c11_162 = arith.constant 11 : index
    %389 = memref.load %arg4[%c2_161, %c11_162] : memref<8x12xf32, #tpu.memory_space<smem>>
    %390 = vector.extract_strided_slice %333 {offsets = [0, 384], sizes = [16, 128], strides = [1, 1]} : vector<16x512xf32> to vector<16x128xf32>
    %391 = vector.broadcast %389 : f32 to vector<16x128xf32>
    %392 = arith.mulf %391, %390 : vector<16x128xf32>
    %393 = arith.addf %388, %392 : vector<16x128xf32>
    %c3_163 = arith.constant 3 : index
    %c8_164 = arith.constant 8 : index
    %394 = memref.load %arg4[%c3_163, %c8_164] : memref<8x12xf32, #tpu.memory_space<smem>>
    %395 = vector.extract_strided_slice %333 {offsets = [0, 0], sizes = [16, 128], strides = [1, 1]} : vector<16x512xf32> to vector<16x128xf32>
    %396 = vector.broadcast %394 : f32 to vector<16x128xf32>
    %397 = arith.mulf %396, %395 : vector<16x128xf32>
    %398 = arith.addf %247, %397 : vector<16x128xf32>
    %c3_165 = arith.constant 3 : index
    %c9_166 = arith.constant 9 : index
    %399 = memref.load %arg4[%c3_165, %c9_166] : memref<8x12xf32, #tpu.memory_space<smem>>
    %400 = vector.extract_strided_slice %333 {offsets = [0, 128], sizes = [16, 128], strides = [1, 1]} : vector<16x512xf32> to vector<16x128xf32>
    %401 = vector.broadcast %399 : f32 to vector<16x128xf32>
    %402 = arith.mulf %401, %400 : vector<16x128xf32>
    %403 = arith.addf %398, %402 : vector<16x128xf32>
    %c3_167 = arith.constant 3 : index
    %c10_168 = arith.constant 10 : index
    %404 = memref.load %arg4[%c3_167, %c10_168] : memref<8x12xf32, #tpu.memory_space<smem>>
    %405 = vector.extract_strided_slice %333 {offsets = [0, 256], sizes = [16, 128], strides = [1, 1]} : vector<16x512xf32> to vector<16x128xf32>
    %406 = vector.broadcast %404 : f32 to vector<16x128xf32>
    %407 = arith.mulf %406, %405 : vector<16x128xf32>
    %408 = arith.addf %403, %407 : vector<16x128xf32>
    %c3_169 = arith.constant 3 : index
    %c11_170 = arith.constant 11 : index
    %409 = memref.load %arg4[%c3_169, %c11_170] : memref<8x12xf32, #tpu.memory_space<smem>>
    %410 = vector.extract_strided_slice %333 {offsets = [0, 384], sizes = [16, 128], strides = [1, 1]} : vector<16x512xf32> to vector<16x128xf32>
    %411 = vector.broadcast %409 : f32 to vector<16x128xf32>
    %412 = arith.mulf %411, %410 : vector<16x128xf32>
    %413 = arith.addf %408, %412 : vector<16x128xf32>
    %c4_171 = arith.constant 4 : index
    %c8_172 = arith.constant 8 : index
    %414 = memref.load %arg4[%c4_171, %c8_172] : memref<8x12xf32, #tpu.memory_space<smem>>
    %415 = vector.extract_strided_slice %333 {offsets = [0, 0], sizes = [16, 128], strides = [1, 1]} : vector<16x512xf32> to vector<16x128xf32>
    %416 = vector.broadcast %414 : f32 to vector<16x128xf32>
    %417 = arith.mulf %416, %415 : vector<16x128xf32>
    %418 = arith.addf %267, %417 : vector<16x128xf32>
    %c4_173 = arith.constant 4 : index
    %c9_174 = arith.constant 9 : index
    %419 = memref.load %arg4[%c4_173, %c9_174] : memref<8x12xf32, #tpu.memory_space<smem>>
    %420 = vector.extract_strided_slice %333 {offsets = [0, 128], sizes = [16, 128], strides = [1, 1]} : vector<16x512xf32> to vector<16x128xf32>
    %421 = vector.broadcast %419 : f32 to vector<16x128xf32>
    %422 = arith.mulf %421, %420 : vector<16x128xf32>
    %423 = arith.addf %418, %422 : vector<16x128xf32>
    %c4_175 = arith.constant 4 : index
    %c10_176 = arith.constant 10 : index
    %424 = memref.load %arg4[%c4_175, %c10_176] : memref<8x12xf32, #tpu.memory_space<smem>>
    %425 = vector.extract_strided_slice %333 {offsets = [0, 256], sizes = [16, 128], strides = [1, 1]} : vector<16x512xf32> to vector<16x128xf32>
    %426 = vector.broadcast %424 : f32 to vector<16x128xf32>
    %427 = arith.mulf %426, %425 : vector<16x128xf32>
    %428 = arith.addf %423, %427 : vector<16x128xf32>
    %c4_177 = arith.constant 4 : index
    %c11_178 = arith.constant 11 : index
    %429 = memref.load %arg4[%c4_177, %c11_178] : memref<8x12xf32, #tpu.memory_space<smem>>
    %430 = vector.extract_strided_slice %333 {offsets = [0, 384], sizes = [16, 128], strides = [1, 1]} : vector<16x512xf32> to vector<16x128xf32>
    %431 = vector.broadcast %429 : f32 to vector<16x128xf32>
    %432 = arith.mulf %431, %430 : vector<16x128xf32>
    %433 = arith.addf %428, %432 : vector<16x128xf32>
    %c5_179 = arith.constant 5 : index
    %c8_180 = arith.constant 8 : index
    %434 = memref.load %arg4[%c5_179, %c8_180] : memref<8x12xf32, #tpu.memory_space<smem>>
    %435 = vector.extract_strided_slice %333 {offsets = [0, 0], sizes = [16, 128], strides = [1, 1]} : vector<16x512xf32> to vector<16x128xf32>
    %436 = vector.broadcast %434 : f32 to vector<16x128xf32>
    %437 = arith.mulf %436, %435 : vector<16x128xf32>
    %438 = arith.addf %287, %437 : vector<16x128xf32>
    %c5_181 = arith.constant 5 : index
    %c9_182 = arith.constant 9 : index
    %439 = memref.load %arg4[%c5_181, %c9_182] : memref<8x12xf32, #tpu.memory_space<smem>>
    %440 = vector.extract_strided_slice %333 {offsets = [0, 128], sizes = [16, 128], strides = [1, 1]} : vector<16x512xf32> to vector<16x128xf32>
    %441 = vector.broadcast %439 : f32 to vector<16x128xf32>
    %442 = arith.mulf %441, %440 : vector<16x128xf32>
    %443 = arith.addf %438, %442 : vector<16x128xf32>
    %c5_183 = arith.constant 5 : index
    %c10_184 = arith.constant 10 : index
    %444 = memref.load %arg4[%c5_183, %c10_184] : memref<8x12xf32, #tpu.memory_space<smem>>
    %445 = vector.extract_strided_slice %333 {offsets = [0, 256], sizes = [16, 128], strides = [1, 1]} : vector<16x512xf32> to vector<16x128xf32>
    %446 = vector.broadcast %444 : f32 to vector<16x128xf32>
    %447 = arith.mulf %446, %445 : vector<16x128xf32>
    %448 = arith.addf %443, %447 : vector<16x128xf32>
    %c5_185 = arith.constant 5 : index
    %c11_186 = arith.constant 11 : index
    %449 = memref.load %arg4[%c5_185, %c11_186] : memref<8x12xf32, #tpu.memory_space<smem>>
    %450 = vector.extract_strided_slice %333 {offsets = [0, 384], sizes = [16, 128], strides = [1, 1]} : vector<16x512xf32> to vector<16x128xf32>
    %451 = vector.broadcast %449 : f32 to vector<16x128xf32>
    %452 = arith.mulf %451, %450 : vector<16x128xf32>
    %453 = arith.addf %448, %452 : vector<16x128xf32>
    %c6_187 = arith.constant 6 : index
    %c8_188 = arith.constant 8 : index
    %454 = memref.load %arg4[%c6_187, %c8_188] : memref<8x12xf32, #tpu.memory_space<smem>>
    %455 = vector.extract_strided_slice %333 {offsets = [0, 0], sizes = [16, 128], strides = [1, 1]} : vector<16x512xf32> to vector<16x128xf32>
    %456 = vector.broadcast %454 : f32 to vector<16x128xf32>
    %457 = arith.mulf %456, %455 : vector<16x128xf32>
    %458 = arith.addf %307, %457 : vector<16x128xf32>
    %c6_189 = arith.constant 6 : index
    %c9_190 = arith.constant 9 : index
    %459 = memref.load %arg4[%c6_189, %c9_190] : memref<8x12xf32, #tpu.memory_space<smem>>
    %460 = vector.extract_strided_slice %333 {offsets = [0, 128], sizes = [16, 128], strides = [1, 1]} : vector<16x512xf32> to vector<16x128xf32>
    %461 = vector.broadcast %459 : f32 to vector<16x128xf32>
    %462 = arith.mulf %461, %460 : vector<16x128xf32>
    %463 = arith.addf %458, %462 : vector<16x128xf32>
    %c6_191 = arith.constant 6 : index
    %c10_192 = arith.constant 10 : index
    %464 = memref.load %arg4[%c6_191, %c10_192] : memref<8x12xf32, #tpu.memory_space<smem>>
    %465 = vector.extract_strided_slice %333 {offsets = [0, 256], sizes = [16, 128], strides = [1, 1]} : vector<16x512xf32> to vector<16x128xf32>
    %466 = vector.broadcast %464 : f32 to vector<16x128xf32>
    %467 = arith.mulf %466, %465 : vector<16x128xf32>
    %468 = arith.addf %463, %467 : vector<16x128xf32>
    %c6_193 = arith.constant 6 : index
    %c11_194 = arith.constant 11 : index
    %469 = memref.load %arg4[%c6_193, %c11_194] : memref<8x12xf32, #tpu.memory_space<smem>>
    %470 = vector.extract_strided_slice %333 {offsets = [0, 384], sizes = [16, 128], strides = [1, 1]} : vector<16x512xf32> to vector<16x128xf32>
    %471 = vector.broadcast %469 : f32 to vector<16x128xf32>
    %472 = arith.mulf %471, %470 : vector<16x128xf32>
    %473 = arith.addf %468, %472 : vector<16x128xf32>
    %c7_195 = arith.constant 7 : index
    %c8_196 = arith.constant 8 : index
    %474 = memref.load %arg4[%c7_195, %c8_196] : memref<8x12xf32, #tpu.memory_space<smem>>
    %475 = vector.extract_strided_slice %333 {offsets = [0, 0], sizes = [16, 128], strides = [1, 1]} : vector<16x512xf32> to vector<16x128xf32>
    %476 = vector.broadcast %474 : f32 to vector<16x128xf32>
    %477 = arith.mulf %476, %475 : vector<16x128xf32>
    %478 = arith.addf %327, %477 : vector<16x128xf32>
    %c7_197 = arith.constant 7 : index
    %c9_198 = arith.constant 9 : index
    %479 = memref.load %arg4[%c7_197, %c9_198] : memref<8x12xf32, #tpu.memory_space<smem>>
    %480 = vector.extract_strided_slice %333 {offsets = [0, 128], sizes = [16, 128], strides = [1, 1]} : vector<16x512xf32> to vector<16x128xf32>
    %481 = vector.broadcast %479 : f32 to vector<16x128xf32>
    %482 = arith.mulf %481, %480 : vector<16x128xf32>
    %483 = arith.addf %478, %482 : vector<16x128xf32>
    %c7_199 = arith.constant 7 : index
    %c10_200 = arith.constant 10 : index
    %484 = memref.load %arg4[%c7_199, %c10_200] : memref<8x12xf32, #tpu.memory_space<smem>>
    %485 = vector.extract_strided_slice %333 {offsets = [0, 256], sizes = [16, 128], strides = [1, 1]} : vector<16x512xf32> to vector<16x128xf32>
    %486 = vector.broadcast %484 : f32 to vector<16x128xf32>
    %487 = arith.mulf %486, %485 : vector<16x128xf32>
    %488 = arith.addf %483, %487 : vector<16x128xf32>
    %c7_201 = arith.constant 7 : index
    %c11_202 = arith.constant 11 : index
    %489 = memref.load %arg4[%c7_201, %c11_202] : memref<8x12xf32, #tpu.memory_space<smem>>
    %490 = vector.extract_strided_slice %333 {offsets = [0, 384], sizes = [16, 128], strides = [1, 1]} : vector<16x512xf32> to vector<16x128xf32>
    %491 = vector.broadcast %489 : f32 to vector<16x128xf32>
    %492 = arith.mulf %491, %490 : vector<16x128xf32>
    %493 = arith.addf %488, %492 : vector<16x128xf32>
    %c0_203 = arith.constant 0 : index
    %494 = memref.load %arg5[%c0_203] : memref<8xf32, #tpu.memory_space<smem>>
    %495 = vector.broadcast %494 : f32 to vector<16x128xf32>
    %496 = arith.addf %353, %495 : vector<16x128xf32>
    %c0_204 = arith.constant 0 : index
    %c0_205 = arith.constant 0 : index
    %c0_206 = arith.constant 0 : index
    %c0_207 = arith.constant 0 : index
    %497 = vector.load %arg6[%c0_204, %c0_205, %c0_206, %c0_207] : memref<1x8x16x128xf32, #tpu.memory_space<vmem>>, vector<1x1x16x128xf32>
    %498 = vector.shape_cast %497 : vector<1x1x16x128xf32> to vector<16x128xf32>
    %499 = vector.shape_cast %496 : vector<16x128xf32> to vector<1x1x16x128xf32>
    tpu.vector_store %arg6[%c0_204, %c0_205, %c0_206, %c0_207], %499 {strides = array<i32>} : memref<1x8x16x128xf32, #tpu.memory_space<vmem>>, vector<1x1x16x128xf32>,
    %c1_208 = arith.constant 1 : index
    %500 = memref.load %arg5[%c1_208] : memref<8xf32, #tpu.memory_space<smem>>
    %501 = vector.broadcast %500 : f32 to vector<16x128xf32>
    %502 = arith.addf %373, %501 : vector<16x128xf32>
    %c0_209 = arith.constant 0 : index
    %c1_210 = arith.constant 1 : index
    %c0_211 = arith.constant 0 : index
    %c0_212 = arith.constant 0 : index
    %503 = vector.load %arg6[%c0_209, %c1_210, %c0_211, %c0_212] : memref<1x8x16x128xf32, #tpu.memory_space<vmem>>, vector<1x1x16x128xf32>
    %504 = vector.shape_cast %503 : vector<1x1x16x128xf32> to vector<16x128xf32>
    %505 = vector.shape_cast %502 : vector<16x128xf32> to vector<1x1x16x128xf32>
    tpu.vector_store %arg6[%c0_209, %c1_210, %c0_211, %c0_212], %505 {strides = array<i32>} : memref<1x8x16x128xf32, #tpu.memory_space<vmem>>, vector<1x1x16x128xf32>,
    %c2_213 = arith.constant 2 : index
    %506 = memref.load %arg5[%c2_213] : memref<8xf32, #tpu.memory_space<smem>>
    %507 = vector.broadcast %506 : f32 to vector<16x128xf32>
    %508 = arith.addf %393, %507 : vector<16x128xf32>
    %c0_214 = arith.constant 0 : index
    %c2_215 = arith.constant 2 : index
    %c0_216 = arith.constant 0 : index
    %c0_217 = arith.constant 0 : index
    %509 = vector.load %arg6[%c0_214, %c2_215, %c0_216, %c0_217] : memref<1x8x16x128xf32, #tpu.memory_space<vmem>>, vector<1x1x16x128xf32>
    %510 = vector.shape_cast %509 : vector<1x1x16x128xf32> to vector<16x128xf32>
    %511 = vector.shape_cast %508 : vector<16x128xf32> to vector<1x1x16x128xf32>
    tpu.vector_store %arg6[%c0_214, %c2_215, %c0_216, %c0_217], %511 {strides = array<i32>} : memref<1x8x16x128xf32, #tpu.memory_space<vmem>>, vector<1x1x16x128xf32>,
    %c3_218 = arith.constant 3 : index
    %512 = memref.load %arg5[%c3_218] : memref<8xf32, #tpu.memory_space<smem>>
    %513 = vector.broadcast %512 : f32 to vector<16x128xf32>
    %514 = arith.addf %413, %513 : vector<16x128xf32>
    %c0_219 = arith.constant 0 : index
    %c3_220 = arith.constant 3 : index
    %c0_221 = arith.constant 0 : index
    %c0_222 = arith.constant 0 : index
    %515 = vector.load %arg6[%c0_219, %c3_220, %c0_221, %c0_222] : memref<1x8x16x128xf32, #tpu.memory_space<vmem>>, vector<1x1x16x128xf32>
    %516 = vector.shape_cast %515 : vector<1x1x16x128xf32> to vector<16x128xf32>
    %517 = vector.shape_cast %514 : vector<16x128xf32> to vector<1x1x16x128xf32>
    tpu.vector_store %arg6[%c0_219, %c3_220, %c0_221, %c0_222], %517 {strides = array<i32>} : memref<1x8x16x128xf32, #tpu.memory_space<vmem>>, vector<1x1x16x128xf32>,
    %c4_223 = arith.constant 4 : index
    %518 = memref.load %arg5[%c4_223] : memref<8xf32, #tpu.memory_space<smem>>
    %519 = vector.broadcast %518 : f32 to vector<16x128xf32>
    %520 = arith.addf %433, %519 : vector<16x128xf32>
    %c0_224 = arith.constant 0 : index
    %c4_225 = arith.constant 4 : index
    %c0_226 = arith.constant 0 : index
    %c0_227 = arith.constant 0 : index
    %521 = vector.load %arg6[%c0_224, %c4_225, %c0_226, %c0_227] : memref<1x8x16x128xf32, #tpu.memory_space<vmem>>, vector<1x1x16x128xf32>
    %522 = vector.shape_cast %521 : vector<1x1x16x128xf32> to vector<16x128xf32>
    %523 = vector.shape_cast %520 : vector<16x128xf32> to vector<1x1x16x128xf32>
    tpu.vector_store %arg6[%c0_224, %c4_225, %c0_226, %c0_227], %523 {strides = array<i32>} : memref<1x8x16x128xf32, #tpu.memory_space<vmem>>, vector<1x1x16x128xf32>,
    %c5_228 = arith.constant 5 : index
    %524 = memref.load %arg5[%c5_228] : memref<8xf32, #tpu.memory_space<smem>>
    %525 = vector.broadcast %524 : f32 to vector<16x128xf32>
    %526 = arith.addf %453, %525 : vector<16x128xf32>
    %c0_229 = arith.constant 0 : index
    %c5_230 = arith.constant 5 : index
    %c0_231 = arith.constant 0 : index
    %c0_232 = arith.constant 0 : index
    %527 = vector.load %arg6[%c0_229, %c5_230, %c0_231, %c0_232] : memref<1x8x16x128xf32, #tpu.memory_space<vmem>>, vector<1x1x16x128xf32>
    %528 = vector.shape_cast %527 : vector<1x1x16x128xf32> to vector<16x128xf32>
    %529 = vector.shape_cast %526 : vector<16x128xf32> to vector<1x1x16x128xf32>
    tpu.vector_store %arg6[%c0_229, %c5_230, %c0_231, %c0_232], %529 {strides = array<i32>} : memref<1x8x16x128xf32, #tpu.memory_space<vmem>>, vector<1x1x16x128xf32>,
    %c6_233 = arith.constant 6 : index
    %530 = memref.load %arg5[%c6_233] : memref<8xf32, #tpu.memory_space<smem>>
    %531 = vector.broadcast %530 : f32 to vector<16x128xf32>
    %532 = arith.addf %473, %531 : vector<16x128xf32>
    %c0_234 = arith.constant 0 : index
    %c6_235 = arith.constant 6 : index
    %c0_236 = arith.constant 0 : index
    %c0_237 = arith.constant 0 : index
    %533 = vector.load %arg6[%c0_234, %c6_235, %c0_236, %c0_237] : memref<1x8x16x128xf32, #tpu.memory_space<vmem>>, vector<1x1x16x128xf32>
    %534 = vector.shape_cast %533 : vector<1x1x16x128xf32> to vector<16x128xf32>
    %535 = vector.shape_cast %532 : vector<16x128xf32> to vector<1x1x16x128xf32>
    tpu.vector_store %arg6[%c0_234, %c6_235, %c0_236, %c0_237], %535 {strides = array<i32>} : memref<1x8x16x128xf32, #tpu.memory_space<vmem>>, vector<1x1x16x128xf32>,
    %c7_238 = arith.constant 7 : index
    %536 = memref.load %arg5[%c7_238] : memref<8xf32, #tpu.memory_space<smem>>
    %537 = vector.broadcast %536 : f32 to vector<16x128xf32>
    %538 = arith.addf %493, %537 : vector<16x128xf32>
    %c0_239 = arith.constant 0 : index
    %c7_240 = arith.constant 7 : index
    %c0_241 = arith.constant 0 : index
    %c0_242 = arith.constant 0 : index
    %539 = vector.load %arg6[%c0_239, %c7_240, %c0_241, %c0_242] : memref<1x8x16x128xf32, #tpu.memory_space<vmem>>, vector<1x1x16x128xf32>
    %540 = vector.shape_cast %539 : vector<1x1x16x128xf32> to vector<16x128xf32>
    %541 = vector.shape_cast %538 : vector<16x128xf32> to vector<1x1x16x128xf32>
    tpu.vector_store %arg6[%c0_239, %c7_240, %c0_241, %c0_242], %541 {strides = array<i32>} : memref<1x8x16x128xf32, #tpu.memory_space<vmem>>, vector<1x1x16x128xf32>,
    return
  }
  func.func @transform_0(%arg0: i32, %arg1: i32) -> (i32, i32, i32, i32) {
    %c0_i32 = arith.constant 0 : i32
    %c0_i32_0 = arith.constant 0 : i32
    %c0_i32_1 = arith.constant 0 : i32
    return %arg0, %c0_i32, %c0_i32_0, %arg1 : i32, i32, i32, i32
  }
  func.func @transform_1(%arg0: i32, %arg1: i32) -> (i32, i32) {
    %c0_i32 = arith.constant 0 : i32
    %c0_i32_0 = arith.constant 0 : i32
    %c0_i32_1 = arith.constant 0 : i32
    return %c0_i32, %c0_i32_0 : i32, i32
  }
  func.func @transform_2(%arg0: i32, %arg1: i32) -> (i32, i32) {
    %c0_i32 = arith.constant 0 : i32
    %c0_i32_0 = arith.constant 0 : i32
    %c0_i32_1 = arith.constant 0 : i32
    return %c0_i32, %c0_i32_0 : i32, i32
  }
  func.func @transform_3(%arg0: i32, %arg1: i32) -> i32 {
    %c0_i32 = arith.constant 0 : i32
    %c0_i32_0 = arith.constant 0 : i32
    return %c0_i32 : i32
  }
  func.func @transform_4(%arg0: i32, %arg1: i32) -> (i32, i32, i32, i32) {
    %c0_i32 = arith.constant 0 : i32
    %c0_i32_0 = arith.constant 0 : i32
    %c0_i32_1 = arith.constant 0 : i32
    return %arg0, %c0_i32, %c0_i32_0, %arg1 : i32, i32, i32, i32
  }
}

</mosaic_0001>

<bundles_post_ra>
// kernel: tpu_custom_call.1
= control target key start
LH: loop header
LB: loop body
LE: loop exit
PB: predicated region body
PF: predicated region fallthrough
CT: control target
= control target key end

     0   :  { %s3300_s0 = inlined_call_operand.hbm [shape: f32[2,4,16,128], index: 0, kind: input, shape index: {}]   ;;  %s3301_s1 = inlined_call_operand.hbm [shape: f32[16,16], index: 1, kind: input, shape index: {}]   ;;  %s3302_s2 = inlined_call_operand.hbm [shape: f32[8,12], index: 2, kind: input, shape index: {}]   ;;  %s3303_s3 = inlined_call_operand.vmem [shape: f32[8], index: 3, kind: input, shape index: {}]   ;;  %s3304_s4 = inlined_call_operand.hbm [shape: f32[2,8,16,128], index: 4, kind: output, shape index: {}]  }
   0x1   :  { %3408 = sst [smem:[#allocation59_spill]] %s3300_s0 }
   0x2   :  { %3409 = sst [smem:[#allocation60_spill]] %s3301_s1 }
   0x3   :  { %3410 = sst [smem:[#allocation61_spill]] %s3302_s2 }
   0x4   :  { %3411 = sst [smem:[#allocation62_spill]] %s3303_s3 }
   0x5   :  { %3412 = sst [smem:[#allocation63_spill]] %s3304_s4 }
   0x6   :  { %9 = vsyncpa [#allocation3], 0 }
   0x7   :  { %11 = vsyncpa [#allocation3 + $0x1], 0 }
   0x8   :  { %12 = vsyncpa [#allocation8], 0 }
   0x9   :  { %13 = vsyncpa [#allocation5], 0 }
   0xa   :  { %14 = vsyncpa [#allocation6], 0 }
   0xb   :  { %15 = vsyncpa [#allocation4], 0 }
   0xc   :  { %17 = vsyncpa [#allocation4 + $0x1], 0  ;;  %s1874_s15 = smov 0   ;;  %s1876_s16 = smov 0  }
   0xd   :  { %s1878_s17 = smov 0   ;;  %s1880_s18 = smov 0  }
   0xe   :  { %s1882_s19 = smov 0   ;;  %s1884_s20 = smov 0  }
   0xf LB: > { %3413 = sst [smem:[#allocation17_spill]] %s1817_s15  ;;  %s1390_s21 = sadd.s32 4294967295, %s1837_s20   ;;  %s1837_s20 = sphi %s1884_s20, %s23_s20   ;;  %s1833_s19 = sphi %s1882_s19, %s3642_s19   ;;  %s1829_s18 = sphi %s1880_s18, %s3641_s18   ;;  %s1825_s17 = sphi %s1878_s17, %s3640_s17   ;;  %s1821_s16 = sphi %s1876_s16, %s3639_s16   ;;  %s1817_s15 = sphi %s1874_s15, %s3638_s15  }
  0x10   : > { %3414 = sst [smem:[#allocation18_spill]] %s1821_s16  ;;  %s1391_s22 = sadd.s32 4294967294, %s1837_s20  }
  0x11   : > { %3415 = sst [smem:[#allocation19_spill]] %s1825_s17  ;;  %p57_p0 = scmp.ne.s32.totalorder %s1821_s16, %s1817_s15 }
  0x12   : > { %3416 = sst [smem:[#allocation20_spill]] %s1829_s18  ;;  %p1908_p1 = scmp.eq.s32.totalorder %s1390_s21, 0 }
  0x13   : > { %3417 = sst [smem:[#allocation21_spill]] %s1833_s19  ;;  %p1912_p2 = scmp.eq.s32.totalorder %s1390_s21, 1 }
  0x14   : > { %3418 = sst [smem:[#allocation22_spill]] %s1837_s20  ;;  %p152_p3 = scmp.eq.s32.totalorder %s1391_s22, 1 }
  0x15   : > { %s3419_s23 = scalar_select %p1908_p1, 1, 0 }
  0x16   : > { %s3420_s24 = scalar_select %p1912_p2, 1, 0 }
  0x17   : > { %p1918_p4 = por %p1908_p1, %p57_p0  ;;  %p1392_p5 = scmp.ge.s32.totalorder %s1837_s20, 1 }
  0x18   : > { %p1923_p6 = por %p152_p3, %p57_p0  ;;  %p159_p7 = scmp.lt.s32.totalorder %s1837_s20, 3 }
  0x19   : > { %s3421_s25 = scalar_select %p1918_p4, 1, 0 }
  0x1a   : > { %s3422_s26 = scalar_select %p1923_p6, 1, 0 }
  0x1b   : > { %p1928_p8 = pnand %p1392_p5, %p159_p7  ;;  %s1839_s28 = smov [#allocation7]  }
  0x1c   : > { %3423 = sst [smem:[#allocation23_spill]] %s3422_s26  ;;  %s171_s29 = sshll.u32 %s1839_s28, 4  ;;  %s172_s29 = int_to_ptr.vmem [resolvable:$true] %s171_s29 }
  0x1d   : > { %s3424_s27 = scalar_select %p1928_p8, 1, 0 }
  0x1e   : > { %p1575_p9 = pneg %p1928_p8  ;;  %s3426_s3 = sld [smem:[#allocation62_spill]] }
  0x1f   : > { %s3427_s1 = sld [smem:[#allocation60_spill]] }
  0x20   : > { %p1937_p11 = pnand %p1575_p9, %p1908_p1 }
  0x22   : > { %p1659_p13 = pneg %p1937_p11 }
  0x24   : > { %s194_s7 = sshll.u32 %s3426_s3, 4  ;;  %s1944_s7 = int_to_ptr.vmem [resolvable:$true] %s194_s7 }
  0x25   : > { %s1657_s10 = scalar_lea.hbm %s3427_s1, 256 }
  0x26   : > { %p1658_p12 = scmp.ne.s32.totalorder %s3427_s1, %s1657_s10  ;;  %p1664_p5 = scmp.lt.u32.totalorder %s1657_s10, %s3427_s1 }
  0x28   : > { %p1660_p0 = pnand %p1659_p13, %p1658_p12 }
  0x2a   : > { %p1661_p3 = pneg %p1660_p0 }
  0x2c   : > { %p1666_p7 = pnand %p1664_p5, %p1661_p3 }
  0x2e   : > { %1669 = shalt.err (!%p1666_p7)
}
  0x2f   : > { %s1670_s21 = scalar_lea.vmem %s172_s29, 256  ;;  %p1678_p1 = scmp.lt.s32.totalorder %s172_s29, %s172_s29 }
  0x30   : > { %p1671_p9 = scmp.ne.s32.totalorder %s172_s29, %s1670_s21  ;;  %p1679_p4 = scmp.lt.s32.totalorder %s1670_s21, %s1670_s21 }
  0x32   : > { %p1673_p10 = pnand %p1671_p9, %p1659_p13  ;;  %p1680_p8 = por %p1679_p4, %p1678_p1 }
  0x34   : > { %p1674_p6 = pneg %p1673_p10 }
  0x36   : > { %p1681_p2 = pnand %p1680_p8, %p1674_p6 }
  0x38   : > { %1684 = shalt.err (!%p1681_p2)
}
  0x39   : > { %s1840_s22 = smov 128   ;;  %s1841_s28 = smov 8  }
  0x3a   : > { %1578 = dma.hbm_to_vmem [thread:$0]  (!%p1937_p11), %s3427_s1, 256, %s172_s29, [#allocation8], %s1840_s22, %s1840_s22, %s1841_s28  }
  0x3b   : > { %s3428_s2 = sld [smem:[#allocation61_spill]] }
  0x41   : > { %s1685_s10 = scalar_lea.hbm %s3428_s2, 128 }
  0x42   : > { %p1686_p1 = scmp.ne.s32.totalorder %s3428_s2, %s1685_s10  ;;  %p1692_p6 = scmp.lt.u32.totalorder %s1685_s10, %s3428_s2 }
  0x44   : > { %p1688_p2 = pnand %p1686_p1, %p1659_p13 }
  0x46   : > { %p1689_p4 = pneg %p1688_p2 }
  0x48   : > { %p1694_p8 = pnand %p1692_p6, %p1689_p4 }
  0x4a   : > { %1697 = shalt.err (!%p1694_p8)
}
  0x4b   : > { %s1842_s21 = smov [#allocation9]   ;;  %s1698_s6 = scalar_lea.vmem %s1944_s7, 16 }
  0x4c   : > { %1581 = dma.hbm_to_smem (!%p1937_p11), %s3428_s2, 128, %s1842_s21, [#allocation5]  }
  0x4d   : > { %p1699_p10 = scmp.ne.s32.totalorder %s1944_s7, %s1698_s6  ;;  %p1706_p3 = scmp.lt.s32.totalorder %s1944_s7, %s1944_s7 }
  0x4e   : > { %p1707_p5 = scmp.lt.s32.totalorder %s1698_s6, %s1698_s6 }
  0x4f   : > { %p1701_p12 = pnand %p1699_p10, %p1659_p13 }
  0x50   : > { %p1708_p7 = por %p1707_p5, %p1706_p3 }
  0x51   : > { %p1702_p0 = pneg %p1701_p12 }
  0x53   : > { %p1709_p9 = pnand %p1708_p7, %p1702_p0 }
  0x55   : > { %1712 = shalt.err (!%p1709_p9)
}
  0x56   : > { %s1843_s8 = smov [#allocation10]   ;;  %s44_s9 = sadd.s32 1, %s1825_s17 }
  0x57   : > { %1584 = dma.vmem_to_smem (!%p1937_p11), %s1944_s7, 16, %s1843_s8, [#allocation6]  }
  0x58   : > { %s35_s10 = sadd.s32 1, %s1833_s19  ;;  %p51_p13 = scmp.ne.s32.totalorder %s1825_s17, %s1821_s16 }
  0x59   : > { %p37_p1 = scmp.ge.s32.totalorder %s35_s10, 2  ;;  %p52_p2 = scmp.eq.s32.totalorder %s1837_s20, 0 }
  0x5a   : > { %p3429_p4 = scmp.ne.s32.totalorder %s3420_s24, 0  ;;  %p1596_p8 = scmp.lt.s32.totalorder %s1837_s20, 2 }
  0x5b   : > { %s3644_s10 = smov (%p37_p1, %s35_s10), 0  ;;  %p53_p10 = por %p52_p2, %p51_p13 }
  0x5c   : > { %p2005_p6 = por %p3429_p4, %p51_p13  ;;  %3432 = sst [smem:[#allocation25_spill]] %s3644_s10 }
  0x5d   : > { %s205_s11 = sand.u32 1, %s1825_s17   ;;  %s39_s12 = ssub.s32 %s1833_s19, %s3644_s10 }
  0x5e   : > { %s3430_s30 = scalar_select %p2005_p6, 1, 0 }
  0x5f   : > { %p42_p12 = scmp.eq.s32.totalorder %s39_s12, 0  ;;  %s1397_s7 = sshll.u32 %s205_s11, 6 }
  0x60   : > { %3431 = sst [smem:[#allocation24_spill]] %s3430_s30  ;;  %s1541_s13 = sshll.u32 %s1833_s19, 10 }
  0x61   : > { %s2017_s14 = scalar_select %p42_p12, %s1825_s17, %s44_s9  }
  0x62   : > { %s3434_s0 = sld [smem:[#allocation59_spill]]  ;;  %s209_s5 = scalar_lea.vmem [#allocation2], %s1397_s7 }
  0x63   : > { %3433 = sst [smem:[#allocation26_spill]] %s2017_s14  ;;  %s217_s6 = sshll.u32 %s209_s5, 4  ;;  %s2024_s6 = int_to_ptr.vmem [resolvable:$true] %s217_s6 }
  0x64   : > { %p2028_p11 = pnand %p1596_p8, %p53_p10  ;;  %s2032_s9 = scalar_lea.sflag [#allocation3], %s205_s11 }
  0x66   : > { %p1715_p3 = pneg %p2028_p11 }
  0x68   : > { %s2022_s24 = scalar_lea.hbm %s3434_s0, %s1541_s13  ;;  %s1718_s21 = scalar_lea.hbm %s3434_s0, 2048 }
  0x69   : > { %s1713_s12 = scalar_lea.hbm %s2022_s24, 1024  ;;  %p1719_p9 = scmp.lt.u32.totalorder %s2022_s24, %s3434_s0 }
  0x6a   : > { %p1714_p0 = scmp.ne.s32.totalorder %s2022_s24, %s1713_s12  ;;  %p1720_p13 = scmp.lt.u32.totalorder %s1718_s21, %s1713_s12 }
  0x6b   : > { %p1722_p2 = scmp.lt.u32.totalorder %s1713_s12, %s2022_s24 }
  0x6c   : > { %p1716_p5 = pnand %p1715_p3, %p1714_p0  ;;  %p1721_p1 = por %p1720_p13, %p1719_p9 }
  0x6e   : > { %p1717_p7 = pneg %p1716_p5  ;;  %p1723_p4 = por %p1722_p2, %p1721_p1 }
  0x70   : > { %p1724_p8 = pnand %p1723_p4, %p1717_p7 }
  0x72   : > { %1727 = shalt.err (!%p1724_p8)
}
  0x73   : > { %s1728_s11 = scalar_lea.vmem %s2024_s6, 1024  ;;  %s1844_s7 = smov [#allocation2]  }
  0x74   : > { %p1729_p10 = scmp.ne.s32.totalorder %s2024_s6, %s1728_s11  ;;  %s1733_s13 = sshll.u32 %s1844_s7, 4  ;;  %s1734_s13 = int_to_ptr.vmem [resolvable:$false] %s1733_s13 }
  0x75   : > { %s1735_s29 = scalar_lea.vmem %s1734_s13, 2048  ;;  %p1736_p5 = scmp.lt.s32.totalorder %s2024_s6, %s1734_s13 }
  0x76   : > { %p1731_p12 = pnand %p1729_p10, %p1715_p3  ;;  %p1737_p9 = scmp.lt.s32.totalorder %s1735_s29, %s1728_s11 }
  0x78   : > { %p1732_p0 = pneg %p1731_p12  ;;  %p1738_p13 = por %p1737_p9, %p1736_p5 }
  0x7a   : > { %p1739_p1 = pnand %p1738_p13, %p1732_p0 }
  0x7c   : > { %1742 = shalt.err (!%p1739_p1)
}
  0x7d   : > { %1588 = dma.hbm_to_vmem [thread:$0]  (!%p2028_p11), %s2022_s24, 1024, %s2024_s6, %s2032_s9, %s1840_s22, %s1840_s22, %s1841_s28  }
  0x7e   : > { %p3436_p3 = scmp.ne.s32.totalorder %s3424_s27, 0 }
  0x80   : > { %229 = sbr.rel (%p3436_p3) target bundleno = 675 (0x2a3), region = 36 }
  0x87   : > { %s2066_s12 = sand.u32 1, %s1821_s16   ;;  %p3438_p7 = scmp.ne.s32.totalorder %s3421_s25, 0 }
  0x88   : > { %3437 = sst [smem:[#allocation27_spill]] %s2066_s12  ;;  %s1401_s21 = sshll.u32 %s2066_s12, 6 }
  0x89   : > { %s232_s5 = scalar_lea.sflag [#allocation3], %s2066_s12  ;;  %s235_s11 = scalar_lea.vmem [#allocation2], %s1401_s21 }
  0x8a   : > { %1796 = dma.done.wait (%p3438_p7), %s232_s5, 1024  }
  0x8b   : > { %1798 = vsyncadd (%p3438_p7), %s232_s5, 4294966272  ;;  %p3439_p2 = scmp.ne.s32.totalorder %s3419_s23, 0 }
  0x8d   : > { %1800 = dma.done.wait (%p3439_p2), [#allocation8], 256  }
  0x8e   : > { %1802 = vsyncadd (%p3439_p2), [#allocation8], 4294967040 }
  0x8f   : > { %1804 = dma.done.wait (%p3439_p2), [#allocation5], 128  }
  0x90   : > { %1806 = vsyncadd (%p3439_p2), [#allocation5], 4294967168 }
  0x91   : > { %1808 = dma.done.wait (%p3439_p2), [#allocation6], 16  }
  0x92   : > { %1810 = vsyncadd (%p3439_p2), [#allocation6], 4294967280 }
  0x93   : > { %252 = sfence }
  0x94   : > { %v2086_v0 = vld [vmem:[%s235_s11 + $0x10] sm:$0xff]  ;;  %v2088_v1 = vld [vmem:[%s235_s11 + $0x18] sm:$0xff]  ;;  %v2098_v6 = vld [vmem:[%s235_s11] sm:$0xff]  ;;  %v3317_v12 = vmov 0.0   ;;  %vm470_vm0 = vcmask 130048   ;;  %s1412_s23 = sld [smem:[#allocation9 + $0x1]] }
  0x95   : > { %v1543_v2 = vpack.c.bf16 %v2088_v1, %v2086_v0  ;;  %v2092_v3 = vld [vmem:[%s235_s11 + $0x30] sm:$0xff]  ;;  %v2094_v4 = vld [vmem:[%s235_s11 + $0x38] sm:$0xff]  ;;  %v2100_v7 = vld [vmem:[%s235_s11 + $0x8] sm:$0xff]  ;;  %541 = vmatprep.mubr.f32.mxu0 %v3317_v12  ;;  %618 = vmatprep.mubr.f32.mxu1 %v3317_v12  ;;  %s1416_s25 = sld [smem:[#allocation9 + $0x81]]  ;;  %s2136_s9 = sld [smem:[#allocation9]] }
  0x96   : > { %v1547_v5 = vpack.c.bf16 %v2094_v4, %v2092_v3  ;;  %v1545_v8 = vpack.c.bf16 %v2100_v7, %v2098_v6  ;;  %v2104_v9 = vld [vmem:[%s235_s11 + $0x20] sm:$0xff]  ;;  %v2106_v10 = vld [vmem:[%s235_s11 + $0x28] sm:$0xff]  ;;  %s1420_s27 = sld [smem:[#allocation9 + $0x101]]  ;;  %s2138_s7 = sld [smem:[#allocation9 + $0x80]]  ;;  %v2154_v20 = vmul.f32 0.05, %v2098_v6 }
  0x97   : > { %1544 = vmatprep.subr.bf16.mxu0 %v1543_v2  ;;  %v1549_v11 = vpack.c.bf16 %v2106_v10, %v2104_v9  ;;  %v2111_v13 = vld [vmem:[#allocation7] sm:$0xff]  ;;  %v2118_v14 = vld [vmem:[#allocation7 + $0x8] sm:$0xff]  ;;  %s1424_s22 = sld [smem:[#allocation9 + $0x181]]  ;;  %s2140_s13 = sld [smem:[#allocation9 + $0x100]]  ;;  %v2282_v2 = vmul.f32 0.05, %v2086_v0 }
  0x98   : > { %1548 = vmatprep.subr.bf16.mxu1 %v1547_v5  ;;  %1546 = vmatpush1.bf16.msra.mxu0 %v1545_v8  ;;  %s2128_s28 = sld [smem:[#allocation9 + $0x201]]  ;;  %s2142_s29 = sld [smem:[#allocation9 + $0x180]]  ;;  %3440 = vst [vmem:[#allocation28_spill] sm:$0xff] %v2154_v20 }
  0x99   : > { %1550 = vmatpush1.bf16.msra.mxu1 %v1549_v11  ;;  %s2130_s24 = sld [smem:[#allocation9 + $0x281]]  ;;  %s2144_s21 = sld [smem:[#allocation9 + $0x200]]  ;;  %3452 = vst [vmem:[#allocation40_spill] sm:$0xff] %v2282_v2 }
  0x9a   : > { %s2132_s6 = sld [smem:[#allocation9 + $0x301]]  ;;  %v291_v15 = vstv %s1412_s23  ;;  %s2146_s5 = sld [smem:[#allocation9 + $0x280]] }
  0x9b   : > { %1443 = vmatmul.mubr.msk.f32.vlgmr.msra.gmra.mrb[0].mxu0 %vm470_vm0, %v2111_v13  ;;  %s2134_s8 = sld [smem:[#allocation9 + $0x381]]  ;;  %v313_v16 = vstv %s1416_s25  ;;  %s2148_s11 = sld [smem:[#allocation9 + $0x300]]  ;;  %v2157_v21 = vmul.f32 %v2086_v0, %v291_v15  ;;  %v2160_v22 = vmul.f32 %v2088_v1, %v291_v15  ;;  %v287_v36 = vstv %s2136_s9 }
  0x9c   : > { %1445 = vmatmul.mubr.msk.f32.vlgmr.msra.gmra.mrb[0].mxu1 %vm470_vm0, %v2111_v13  ;;  %547 = vmatprep.mubr.f32.mxu0 %v3317_v12  ;;  %v335_v17 = vstv %s1420_s27  ;;  %s2151_s0 = sld [smem:[#allocation9 + $0x380]]  ;;  %v2163_v23 = vmul.f32 %v2086_v0, %v313_v16  ;;  %v2167_v25 = vmul.f32 %v2088_v1, %v313_v16  ;;  %s2176_s23 = sld [smem:[#allocation9 + $0x4]]  ;;  %v309_v39 = vstv %s2138_s7 }
  0x9d   : > { %624 = vmatprep.mubr.f32.mxu1 %v3317_v12  ;;  %v357_v18 = vstv %s1424_s22  ;;  %v2170_v26 = vmul.f32 %v2086_v0, %v335_v17  ;;  %v2173_v27 = vmul.f32 %v2088_v1, %v335_v17  ;;  %s2188_s25 = sld [smem:[#allocation9 + $0x84]]  ;;  %v331_v40 = vstv %s2140_s13  ;;  %s2228_s9 = sld [smem:[#allocation9 + $0x5]] }
  0x9e   : > { %v379_v19 = vstv %s2128_s28  ;;  %v2179_v29 = vmul.f32 %v2086_v0, %v357_v18  ;;  %v2182_v30 = vmul.f32 %v2088_v1, %v357_v18  ;;  %s2190_s27 = sld [smem:[#allocation9 + $0x104]]  ;;  %v353_v43 = vstv %s2142_s29  ;;  %s2236_s7 = sld [smem:[#allocation9 + $0x85]] }
  0x9f   : > { %1444 = vmatmul.mubr.msk.f32.gmra.mrb[2].mxu0 %vm470_vm0, %v2118_v14  ;;  %v401_v24 = vstv %s2130_s24  ;;  %v2185_v31 = vmul.f32 %v2086_v0, %v379_v19  ;;  %v2193_v33 = vmul.f32 %v2088_v1, %v379_v19  ;;  %s2202_s22 = sld [smem:[#allocation9 + $0x184]]  ;;  %v375_v44 = vstv %s2144_s21  ;;  %s2238_s13 = sld [smem:[#allocation9 + $0x105]] }
  0xa0   : > { %1446 = vmatmul.mubr.msk.f32.gmra.mrb[2].mxu1 %vm470_vm0, %v2118_v14  ;;  %903 = vmatprep.mubr.f32.mxu0 %v3317_v12  ;;  %v423_v28 = vstv %s2132_s6  ;;  %v2196_v34 = vmul.f32 %v2086_v0, %v401_v24  ;;  %v2199_v35 = vmul.f32 %v2088_v1, %v401_v24  ;;  %s2204_s28 = sld [smem:[#allocation9 + $0x204]]  ;;  %v288_v45 = vmul.f32 %v287_v36, %v2098_v6  ;;  %s2246_s29 = sld [smem:[#allocation9 + $0x185]] }
  0xa1   : > { %980 = vmatprep.mubr.f32.mxu1 %v3317_v12  ;;  %v445_v32 = vstv %s2134_s8  ;;  %v2207_v37 = vmul.f32 %v2086_v0, %v423_v28  ;;  %v2210_v38 = vmul.f32 %v2088_v1, %v423_v28  ;;  %s2214_s24 = sld [smem:[#allocation9 + $0x284]]  ;;  %v2232_v46 = vmul.f32 %v287_v36, %v2100_v7  ;;  %s2248_s21 = sld [smem:[#allocation9 + $0x2]] }
  0xa2   : > { %s2216_s6 = sld [smem:[#allocation9 + $0x304]]  ;;  %v2219_v41 = vmul.f32 %v2086_v0, %v445_v32  ;;  %v2222_v42 = vmul.f32 %v2088_v1, %v445_v32  ;;  %v397_v47 = vstv %s2146_s5  ;;  %v419_v48 = vstv %s2148_s11  ;;  %s2258_s5 = sld [smem:[#allocation9 + $0x82]] }
  0xa3   : > { %3441 = sst [smem:[#allocation29_spill]] %s2188_s25  ;;  %s2226_s8 = sld [smem:[#allocation9 + $0x384]]  ;;  %v310_v49 = vmul.f32 %v309_v39, %v2098_v6  ;;  %v2242_v50 = vmul.f32 %v309_v39, %v2100_v7  ;;  %v332_v51 = vmul.f32 %v331_v40, %v2098_v6  ;;  %v441_v52 = vstv %s2151_s0 }
  0xa4   : > { %3442 = sst [smem:[#allocation30_spill]] %s2190_s27  ;;  %v2251_v53 = vmul.f32 %v331_v40, %v2100_v7  ;;  %v354_v54 = vmul.f32 %v353_v43, %v2098_v6  ;;  %v2255_v55 = vmul.f32 %v353_v43, %v2100_v7  ;;  %v376_v56 = vmul.f32 %v375_v44, %v2098_v6  ;;  %s2260_s0 = sld [smem:[#allocation9 + $0x102]] }
  0xa5   : > { %3443 = sst [smem:[#allocation31_spill]] %s2202_s22  ;;  %v2263_v57 = vmul.f32 %v375_v44, %v2100_v7  ;;  %v398_v58 = vmul.f32 %v397_v47, %v2098_v6  ;;  %v2267_v59 = vmul.f32 %v397_v47, %v2100_v7  ;;  %v420_v60 = vmul.f32 %v419_v48, %v2098_v6  ;;  %s2270_s11 = sld [smem:[#allocation9 + $0x3]] }
  0xa6   : > { %3444 = sst [smem:[#allocation32_spill]] %s2204_s28  ;;  %s2272_s1 = sld [smem:[#allocation9 + $0x182]]  ;;  %v2275_v61 = vmul.f32 %v419_v48, %v2100_v7  ;;  %v442_v62 = vmul.f32 %v441_v52, %v2098_v6  ;;  %v2279_v63 = vmul.f32 %v441_v52, %v2100_v7  ;;  %v2292_v15 = vmul.f32 0.05, %v2104_v9 }
  0xa7   : > { %3445 = sst [smem:[#allocation33_spill]] %s2214_s24  ;;  %s2284_s2 = sld [smem:[#allocation9 + $0x202]]  ;;  %v2302_v17 = vmul.f32 0.05, %v2092_v3  ;;  %v2312_v28 = vmul.f32 0.05, %v2100_v7  ;;  %v294_v39 = vadd.f32 %v2157_v21, %v288_v45  ;;  %v316_v40 = vadd.f32 %v2163_v23, %v310_v49 }
  0xa8   : > { %3446 = sst [smem:[#allocation34_spill]] %s2216_s6  ;;  %s2286_s3 = sld [smem:[#allocation9 + $0x282]]  ;;  %3453 = vst [vmem:[#allocation41_spill] sm:$0xff] %v2292_v15  ;;  %v2326_v44 = vmul.f32 0.05, %v2106_v10  ;;  %v297_v7 = vstv %s2248_s21  ;;  %v338_v47 = vadd.f32 %v2170_v26, %v332_v51  ;;  %v319_v48 = vstv %s2258_s5 }
  0xa9   : > { %3447 = sst [smem:[#allocation35_spill]] %s2226_s8  ;;  %s2294_s10 = sld [smem:[#allocation9 + $0x83]]  ;;  %3454 = vst [vmem:[#allocation42_spill] sm:$0xff] %v2302_v17  ;;  %3455 = vst [vmem:[#allocation43_spill] sm:$0xff] %v2312_v28  ;;  %v360_v21 = vadd.f32 %v2179_v29, %v354_v54  ;;  %v382_v23 = vadd.f32 %v2185_v31, %v376_v56  ;;  %v404_v12 = vadd.f32 %v2196_v34, %v398_v58 }
  0xaa   : > { %3448 = sst [smem:[#allocation36_spill]] %s2228_s9  ;;  %s2304_s14 = sld [smem:[#allocation9 + $0x103]]  ;;  %3456 = vst [vmem:[#allocation44_spill] sm:$0xff] %v2326_v44  ;;  %v341_v52 = vstv %s2260_s0  ;;  %v426_v26 = vadd.f32 %v2207_v37, %v420_v60  ;;  %v298_v29 = vmul.f32 %v2104_v9, %v297_v7  ;;  %v448_v34 = vadd.f32 %v2219_v41, %v442_v62 }
  0xab   : > { %3449 = sst [smem:[#allocation37_spill]] %s2236_s7  ;;  %s2296_s19 = sld [smem:[#allocation9 + $0x302]]  ;;  %v3348_v45 = vstv %s2270_s11  ;;  %v320_v37 = vmul.f32 %v2104_v9, %v319_v48  ;;  %v342_v56 = vmul.f32 %v2104_v9, %v341_v52 }
  0xac   : > { %3450 = sst [smem:[#allocation38_spill]] %s2238_s13  ;;  %s2306_s17 = sld [smem:[#allocation9 + $0x183]]  ;;  %v363_v49 = vstv %s2272_s1  ;;  %v304_v60 = vmul.f32 %v2092_v3, %v3348_v45  ;;  %v300_v18 = vadd.f32 %v298_v29, %v294_v39 }
  0xad   : > { %3451 = sst [smem:[#allocation39_spill]] %s2246_s29  ;;  %s2314_s16 = sld [smem:[#allocation9 + $0x203]]  ;;  %v385_v31 = vstv %s2284_s2  ;;  %v364_v62 = vmul.f32 %v2104_v9, %v363_v49  ;;  %v322_v11 = vadd.f32 %v320_v37, %v316_v40  ;;  %v344_v8 = vadd.f32 %v342_v56, %v338_v47 }
  0xae   : > { %s2316_s20 = sld [smem:[#allocation9 + $0x382]]  ;;  %s2322_s26 = sld [smem:[#allocation9 + $0x283]]  ;;  %v407_v51 = vstv %s2286_s3  ;;  %v386_v36 = vmul.f32 %v2104_v9, %v385_v31 }
  0xaf   : > { %s2330_s15 = sld [smem:[#allocation9 + $0x303]]  ;;  %s2342_s4 = sld [smem:[#allocation9 + $0x205]]  ;;  %v3342_v54 = vstv %s2294_s10  ;;  %v408_v24 = vmul.f32 %v2104_v9, %v407_v51  ;;  %v366_v5 = vadd.f32 %v364_v62, %v360_v21 }
  0xb0   : > { %s2340_s30 = sld [smem:[#allocation9 + $0x383]]  ;;  %s2344_s18 = sld [smem:[#allocation9 + $0x285]]  ;;  %v3347_v41 = vstv %s2304_s14  ;;  %v326_v16 = vmul.f32 %v2092_v3, %v3342_v54  ;;  %v388_v37 = vadd.f32 %v386_v36, %v382_v23  ;;  %v2432_v36 = vmul.f32 0.05, %v2088_v1 }
  0xb1   : > { %s2352_s12 = sld [smem:[#allocation9 + $0x305]]  ;;  %v429_v58 = vstv %s2296_s19  ;;  %s2372_s13 = sld [smem:[#allocation9 + $0x6]]  ;;  %v348_v39 = vmul.f32 %v2092_v3, %v3347_v41  ;;  %v410_v56 = vadd.f32 %v408_v24, %v404_v12  ;;  %v2435_v12 = vmul.f32 0.05, %v2094_v4 }
  0xb2   : > { %s2354_s29 = sld [smem:[#allocation9 + $0x385]]  ;;  %v3349_v43 = vstv %s2306_s17  ;;  %s2374_s7 = sld [smem:[#allocation9 + $0x7]]  ;;  %v430_v0 = vmul.f32 %v2104_v9, %v429_v58  ;;  %3459 = vst [vmem:[#allocation47_spill] sm:$0xff] %v2432_v36  ;;  %v2437_v24 = vadd.f32 %v304_v60, %v300_v18 }
  0xb3   : > { %v3350_v32 = vstv %s2314_s16  ;;  %s2384_s9 = sld [smem:[#allocation9 + $0x86]]  ;;  %s2386_s8 = sld [smem:[#allocation9 + $0x87]]  ;;  %v370_v54 = vmul.f32 %v2092_v3, %v3349_v43  ;;  %3460 = vst [vmem:[#allocation48_spill] sm:$0xff] %v2435_v12 }
  0xb4   : > { %v3351_v19 = vstv %s2316_s20  ;;  %v413_v6 = vstv %s2322_s26  ;;  %s2395_s6 = sld [smem:[#allocation9 + $0x106]]  ;;  %s2397_s24 = sld [smem:[#allocation9 + $0x107]]  ;;  %v392_v40 = vmul.f32 %v2092_v3, %v3350_v32  ;;  %v432_v43 = vadd.f32 %v430_v0, %v426_v26 }
  0xb5   : > { %v435_v29 = vstv %s2330_s15  ;;  %s2403_s28 = sld [smem:[#allocation9 + $0x186]]  ;;  %s2405_s22 = sld [smem:[#allocation9 + $0x187]]  ;;  %v452_v47 = vmul.f32 %v2104_v9, %v3351_v19  ;;  %v414_v41 = vmul.f32 %v2092_v3, %v413_v6  ;;  %v3358_v62 = vstv %s2342_s4 }
  0xb6   : > { %s2416_s27 = sld [smem:[#allocation9 + $0x206]]  ;;  %s2418_s25 = sld [smem:[#allocation9 + $0x207]]  ;;  %v457_v21 = vstv %s2340_s30  ;;  %v436_v32 = vmul.f32 %v2092_v3, %v435_v29  ;;  %v2439_v0 = vadd.f32 %v326_v16, %v322_v11  ;;  %v2444_v19 = vadd.f32 %v348_v39, %v344_v8 }
  0xb7   : > { %3458 = sst [smem:[#allocation46_spill]] %s2372_s13  ;;  %v454_v23 = vadd.f32 %v452_v47, %v448_v34  ;;  %v458_v26 = vmul.f32 %v2092_v3, %v457_v21  ;;  %v2446_v1 = vadd.f32 %v370_v54, %v366_v5  ;;  %v2448_v9 = vadd.f32 %v392_v40, %v388_v37  ;;  %s3467_s1 = sld [smem:[#allocation29_spill]] }
  0xb8   : > { %3457 = sst [smem:[#allocation45_spill]] %s2354_s29  ;;  %v2450_v45 = vadd.f32 %v414_v41, %v410_v56  ;;  %v2452_v18 = vadd.f32 %v436_v32, %v432_v43  ;;  %v3357_v11 = vstv %s2372_s13  ;;  %v3356_v16 = vstv %s2374_s7  ;;  %s2468_s13 = sld [smem:[#allocation9 + $0x287]] }
  0xb9   : > { %v3360_v34 = vstv %s2384_s9  ;;  %v2461_v5 = vadd.f32 %v458_v26, %v454_v23  ;;  %s2466_s29 = sld [smem:[#allocation9 + $0x286]]  ;;  %v295_v32 = vadd.f32 %v2160_v22, %v2232_v46  ;;  %v299_v43 = vmul.f32 %v2106_v10, %v297_v7  ;;  %s3468_s2 = sld [smem:[#allocation30_spill]] }
  0xba   : > { %v317_v40 = vadd.f32 %v2167_v25, %v2242_v50  ;;  %v321_v37 = vmul.f32 %v2106_v10, %v319_v48  ;;  %v339_v56 = vadd.f32 %v2173_v27, %v2251_v53  ;;  %v343_v23 = vmul.f32 %v2106_v10, %v341_v52  ;;  %s3469_s3 = sld [smem:[#allocation31_spill]]  ;;  %s3470_s15 = sld [smem:[#allocation32_spill]] }
  0xbb   : > { %v361_v22 = vadd.f32 %v2182_v30, %v2255_v55  ;;  %v365_v46 = vmul.f32 %v2106_v10, %v363_v49  ;;  %v383_v25 = vadd.f32 %v2193_v33, %v2263_v57  ;;  %v387_v50 = vmul.f32 %v2106_v10, %v385_v31  ;;  %s3473_s19 = sld [smem:[#allocation35_spill]]  ;;  %s3475_s26 = sld [smem:[#allocation37_spill]] }
  0xbc   : > { %v405_v27 = vadd.f32 %v2199_v35, %v2267_v59  ;;  %v409_v53 = vmul.f32 %v2106_v10, %v407_v51  ;;  %v427_v30 = vadd.f32 %v2210_v38, %v2275_v61  ;;  %v431_v55 = vmul.f32 %v2106_v10, %v429_v58  ;;  %s3478_s30 = sld [smem:[#allocation39_spill]]  ;;  %s3491_s21 = sld [smem:[#allocation46_spill]] }
  0xbd   : > { %v449_v33 = vadd.f32 %v2222_v42, %v2279_v63  ;;  %v3461_v57 = vstv %s2316_s20  ;;  %v301_v48 = vadd.f32 %v299_v43, %v295_v32  ;;  %v3462_v52 = vstv %s2270_s11  ;;  %s3474_s20 = sld [smem:[#allocation36_spill]]  ;;  %s2638_s5 = sld [smem:[#allocation9 + $0x306]] }
  0xbe   : > { %v453_v7 = vmul.f32 %v2106_v10, %v3461_v57  ;;  %v305_v35 = vmul.f32 %v2094_v4, %v3462_v52  ;;  %v3463_v59 = vstv %s2294_s10  ;;  %v3464_v31 = vstv %s2304_s14  ;;  %s3476_s10 = sld [smem:[#allocation38_spill]]  ;;  %s3484_s14 = sld [smem:[#allocation45_spill]] }
  0xbf   : > { %v327_v49 = vmul.f32 %v2094_v4, %v3463_v59  ;;  %v349_v38 = vmul.f32 %v2094_v4, %v3464_v31  ;;  %v323_v61 = vadd.f32 %v321_v37, %v317_v40  ;;  %v345_v51 = vadd.f32 %v343_v23, %v339_v56  ;;  %s2646_s0 = sld [smem:[#allocation9 + $0x307]] }
  0xc0   : > { %v367_v42 = vadd.f32 %v365_v46, %v361_v22  ;;  %v3465_v63 = vstv %s2306_s17  ;;  %v389_v10 = vadd.f32 %v387_v50, %v383_v25  ;;  %v3466_v26 = vstv %s2314_s16  ;;  %s3471_s16 = sld [smem:[#allocation33_spill]]  ;;  %s3472_s17 = sld [smem:[#allocation34_spill]] }
  0xc1   : > { %v371_v58 = vmul.f32 %v2094_v4, %v3465_v63  ;;  %v393_v32 = vmul.f32 %v2094_v4, %v3466_v26  ;;  %v411_v43 = vadd.f32 %v409_v53, %v405_v27  ;;  %v415_v57 = vmul.f32 %v2094_v4, %v413_v6  ;;  %s2713_s11 = sld [smem:[#allocation9 + $0x387]] }
  0xc2   : > { %v433_v59 = vadd.f32 %v431_v55, %v427_v30  ;;  %v437_v40 = vmul.f32 %v2094_v4, %v435_v29  ;;  %v455_v37 = vadd.f32 %v453_v7, %v449_v33  ;;  %v459_v56 = vmul.f32 %v2094_v4, %v457_v21 }
  0xc3   : > { %v2536_v31 = vadd.f32 %v305_v35, %v301_v48  ;;  %v2538_v30 = vadd.f32 %v327_v49, %v323_v61  ;;  %v2540_v29 = vadd.f32 %v349_v38, %v345_v51  ;;  %v2545_v21 = vadd.f32 %v371_v58, %v367_v42 }
  0xc4   : > { %v2547_v55 = vadd.f32 %v393_v32, %v389_v10  ;;  %v2549_v33 = vadd.f32 %v415_v57, %v411_v43  ;;  %v2554_v49 = vadd.f32 %v437_v40, %v433_v59  ;;  %v2556_v38 = vadd.f32 %v459_v56, %v455_v37 }
  0xc5   : > { %v3477_v61 = vstv %s2176_s23  ;;  %v3479_v42 = vstv %s3467_s1  ;;  %v3480_v58 = vstv %s3468_s2  ;;  %v3481_v57 = vstv %s3469_s3 }
  0xc6   : > { %v3482_v59 = vstv %s3470_s15  ;;  %v3483_v37 = vstv %s3471_s16  ;;  %v3494_v54 = vstv %s3484_s14 }
 0x16e   : > { %v543_v52 = vpop.f32.mrb[0].mxu0 }
 0x16f   : > { %v631_v23 = vmul.f32 0.95, %v543_v52  ;;  %v545_v22 = vpop.f32.mrb[1].mxu0  ;;  %v620_v46 = vpop.f32.mrb[0].mxu1 }
 0x170   : > { %v632_v27 = vmul.f32 0.95, %v545_v22  ;;  %v633_v6 = vmul.f32 0.95, %v620_v46  ;;  %v622_v53 = vpop.f32.mrb[1].mxu1 }
 0x171   : > { %v2543_v4 = vadd.f32 %v631_v23, %v2154_v20  ;;  %v634_v48 = vmul.f32 0.95, %v622_v53  ;;  %v3485_v23 = vstv %s3472_s17  ;;  %v3487_v53 = vstv %s3474_s20 }
 0x172   : > { %v2552_v7 = vadd.f32 %v632_v27, %v2282_v2  ;;  %v549_v35 = vpop.f32.mrb[2].mxu0  ;;  %v2568_v26 = vadd.f32 %v633_v6, %v2292_v15  ;;  %v3486_v27 = vstv %s3473_s19  ;;  %v3512_v20 = vstv %s2386_s8 }
 0x173   : > { %v649_v51 = vmul.f32 %v3477_v61, %v2543_v4  ;;  %v673_v63 = vmul.f32 %v3479_v42, %v2543_v4  ;;  %v697_v10 = vmul.f32 %v3480_v58, %v2543_v4  ;;  %v626_v32 = vpop.f32.mrb[2].mxu1  ;;  %v551_v43 = vpop.f32.mrb[3].mxu0  ;;  %v721_v52 = vmul.f32 %v3481_v57, %v2543_v4 }
 0x174   : > { %v2576_v40 = vmul.f32 %v3482_v59, %v2543_v4  ;;  %v2581_v56 = vmul.f32 %v3483_v37, %v2543_v4  ;;  %v2586_v22 = vmul.f32 %v3485_v23, %v2543_v4  ;;  %v628_v46 = vpop.f32.mrb[3].mxu1  ;;  %v2591_v6 = vmul.f32 %v3486_v27, %v2543_v4 }
 0x175   : > { %v655_v61 = vmul.f32 %v3487_v53, %v2552_v7  ;;  %v3488_v42 = vstv %s3475_s26  ;;  %v3489_v57 = vstv %s3476_s10  ;;  %v3490_v37 = vstv %s3478_s30 }
 0x176   : > { %v679_v58 = vmul.f32 %v3488_v42, %v2552_v7  ;;  %v703_v59 = vmul.f32 %v3489_v57, %v2552_v7  ;;  %v727_v50 = vmul.f32 %v3490_v37, %v2552_v7  ;;  %v2608_v23 = vmul.f32 %v3358_v62, %v2552_v7 }
 0x177   : > { %v3492_v27 = vstv %s2344_s18  ;;  %v3493_v53 = vstv %s2352_s12  ;;  %v2621_v42 = vadd.f32 %v634_v48, %v2302_v17  ;;  %v635_v57 = vmul.f32 0.95, %v549_v35 }
 0x178   : > { %v2613_v39 = vmul.f32 %v3492_v27, %v2552_v7  ;;  %v2618_v25 = vmul.f32 %v3493_v53, %v2552_v7  ;;  %v637_v41 = vmul.f32 0.95, %v626_v32  ;;  %v636_v37 = vmul.f32 0.95, %v551_v43 }
 0x179   : > { %v2626_v8 = vmul.f32 %v3494_v54, %v2552_v7  ;;  %v638_v27 = vmul.f32 0.95, %v628_v46  ;;  %v651_v3 = vadd.f32 %v649_v51, %v2437_v24  ;;  %v675_v53 = vadd.f32 %v673_v63, %v2439_v0 }
 0x17a   : > { %v643_v48 = vadd.f32 %v635_v57, %v2312_v28  ;;  %v2632_v35 = vadd.f32 %v637_v41, %v2326_v44  ;;  %v644_v32 = vadd.f32 %v636_v37, %v2432_v36  ;;  %v661_v54 = vmul.f32 %v3357_v11, %v2568_v26 }
 0x17b   : > { %v2641_v24 = vadd.f32 %v638_v27, %v2435_v12  ;;  %v657_v0 = vadd.f32 %v655_v61, %v651_v3  ;;  %v667_v41 = vmul.f32 %v3356_v16, %v2621_v42  ;;  %v681_v51 = vadd.f32 %v679_v58, %v675_v53 }
 0x17c   : > { %v3495_v63 = vstv %s2176_s23  ;;  %v3496_v46 = vstv %s3467_s1  ;;  %v3497_v37 = vstv %s3468_s2  ;;  %v685_v3 = vmul.f32 %v3360_v34, %v2568_v26  ;;  %s2695_s23 = sld [smem:[#allocation9 + $0x386]]  ;;  %s2920_s1 = sld [smem:[#allocation9 + $0x309]] }
 0x17d   : > { %v2650_v43 = vmul.f32 %v3495_v63, %v643_v48  ;;  %v2654_v57 = vmul.f32 %v3496_v46, %v643_v48  ;;  %v2658_v27 = vmul.f32 %v3497_v37, %v643_v48  ;;  %v3498_v61 = vstv %s3469_s3  ;;  %s2922_s2 = sld [smem:[#allocation9 + $0x389]]  ;;  %s2924_s3 = sld [smem:[#allocation9 + $0xa]] }
 0x17e   : > { %v2665_v16 = vmul.f32 %v3498_v61, %v643_v48  ;;  %v3499_v58 = vstv %s3470_s15  ;;  %v3500_v11 = vstv %s3471_s16  ;;  %v3501_v63 = vstv %s3472_s17  ;;  %s2926_s15 = sld [smem:[#allocation9 + $0x8a]] }
 0x17f   : > { %v2669_v53 = vmul.f32 %v3499_v58, %v643_v48  ;;  %v2673_v47 = vmul.f32 %v3500_v11, %v643_v48  ;;  %v2677_v60 = vmul.f32 %v3501_v63, %v643_v48  ;;  %v3502_v46 = vstv %s3473_s19  ;;  %s2928_s16 = sld [smem:[#allocation9 + $0x10a]] }
 0x180   : > { %v2681_v62 = vmul.f32 %v3502_v46, %v643_v48  ;;  %v3504_v37 = vstv %s3474_s20  ;;  %v3505_v34 = vstv %s3475_s26  ;;  %v3506_v61 = vstv %s3476_s10  ;;  %s2930_s17 = sld [smem:[#allocation9 + $0x18a]] }
 0x181   : > { %v2685_v12 = vmul.f32 %v3504_v37, %v644_v32  ;;  %v2689_v44 = vmul.f32 %v3505_v34, %v644_v32  ;;  %v2693_v58 = vmul.f32 %v3506_v61, %v644_v32  ;;  %v3507_v11 = vstv %s3478_s30  ;;  %s2932_s19 = sld [smem:[#allocation9 + $0x20a]]  ;;  %s2940_s30 = sld [smem:[#allocation9 + $0xb]] }
 0x182   : > { %3503 = vst [vmem:[#allocation49_spill] sm:$0xff] %v2681_v62  ;;  %v2699_v36 = vmul.f32 %v3507_v11, %v644_v32  ;;  %v3508_v63 = vstv %s2342_s4  ;;  %v3509_v28 = vstv %s2344_s18  ;;  %v3510_v37 = vstv %s2352_s12  ;;  %s2892_s4 = sld [smem:[#allocation9 + $0x8]]  ;;  %s2934_s20 = sld [smem:[#allocation9 + $0x28a]] }
 0x183   : > { %v2703_v46 = vmul.f32 %v3508_v63, %v644_v32  ;;  %v2707_v17 = vmul.f32 %v3509_v28, %v644_v32  ;;  %v2711_v34 = vmul.f32 %v3510_v37, %v644_v32  ;;  %v1551_v61 = vpack.c.bf16 %v644_v32, %v2552_v7  ;;  %s2894_s18 = sld [smem:[#allocation9 + $0x88]]  ;;  %s2936_s26 = sld [smem:[#allocation9 + $0x30a]] }
 0x184   : > { %v1555_v15 = vpack.c.bf16 %v2641_v24, %v2621_v42  ;;  %v1553_v11 = vpack.c.bf16 %v643_v48, %v2543_v4  ;;  %v1557_v63 = vpack.c.bf16 %v2632_v35, %v2568_v26  ;;  %v663_v2 = vadd.f32 %v661_v54, %v657_v0  ;;  %s2896_s12 = sld [smem:[#allocation9 + $0x108]]  ;;  %s2938_s10 = sld [smem:[#allocation9 + $0x38a]] }
 0x185   : > { %3511 = vst [vmem:[#allocation50_spill] sm:$0xff] %v2711_v34  ;;  %v687_v28 = vadd.f32 %v685_v3, %v681_v51  ;;  %v691_v37 = vmul.f32 %v3512_v20, %v2621_v42  ;;  %v699_v34 = vadd.f32 %v697_v10, %v2444_v19  ;;  %v3513_v62 = vstv %s3484_s14  ;;  %1552 = vmatprep.subr.bf16.mxu0 %v1551_v61  ;;  %s2942_s14 = sld [smem:[#allocation9 + $0x8b]] }
 0x186   : > { %v2727_v7 = vmul.f32 %v3513_v62, %v644_v32  ;;  %1556 = vmatprep.subr.bf16.mxu1 %v1555_v15  ;;  %v3514_v4 = vstv %s2395_s6  ;;  %v723_v54 = vadd.f32 %v721_v52, %v2446_v1  ;;  %v804_v0 = vstv %s2638_s5  ;;  %1554 = vmatpush1.bf16.msra.mxu0 %v1553_v11  ;;  %s2946_s5 = sld [smem:[#allocation9 + $0x18b]] }
 0x187   : > { %v709_v48 = vmul.f32 %v3514_v4, %v2568_v26  ;;  %1558 = vmatpush1.bf16.msra.mxu1 %v1557_v63  ;;  %v2734_v51 = vadd.f32 %v667_v41, %v663_v2  ;;  %v2736_v20 = vadd.f32 %v691_v37, %v687_v28  ;;  %v705_v19 = vadd.f32 %v703_v59, %v699_v34  ;;  %3549 = sst [smem:[#allocation46_spill]] %s2940_s30  ;;  %s2956_s30 = sld [smem:[#allocation10]] }
 0x188   : > { %v810_v62 = vstv %s2646_s0  ;;  %v3515_v10 = vstv %s2397_s24  ;;  %v729_v32 = vadd.f32 %v727_v50, %v723_v54  ;;  %v3516_v3 = vstv %s2403_s28  ;;  %3546 = sst [smem:[#allocation38_spill]] %s2934_s20  ;;  %s2948_s0 = sld [smem:[#allocation9 + $0x20b]] }
 0x189   : > { %v715_v15 = vmul.f32 %v3515_v10, %v2621_v42  ;;  %v733_v61 = vmul.f32 %v3516_v3, %v2568_v26  ;;  %v747_v1 = vadd.f32 %v2576_v40, %v2448_v9  ;;  %v711_v2 = vadd.f32 %v709_v48, %v705_v19  ;;  %1479 = vmatmul.mubr.msk.f32.vlgmr.msra.gmra.mrb[4].mxu0 %vm470_vm0, %v2111_v13  ;;  %3547 = sst [smem:[#allocation39_spill]] %s2936_s26 }
 0x18a   : > { %v3517_v52 = vstv %s2405_s22  ;;  %v3518_v11 = vstv %s2416_s27  ;;  %v771_v34 = vadd.f32 %v2581_v56, %v2450_v45  ;;  %1481 = vmatmul.mubr.msk.f32.vlgmr.msra.gmra.mrb[4].mxu1 %vm470_vm0, %v2111_v13  ;;  %v3519_v40 = vstv %s2466_s29  ;;  %3537 = sst [smem:[#allocation29_spill]] %s2896_s12 }
 0x18b   : > { %v739_v41 = vmul.f32 %v3517_v52, %v2621_v42  ;;  %v757_v59 = vmul.f32 %v3518_v11, %v2568_v26  ;;  %v735_v9 = vadd.f32 %v733_v61, %v729_v32  ;;  %v753_v50 = vadd.f32 %v2608_v23, %v747_v1  ;;  %3548 = sst [smem:[#allocation45_spill]] %s2938_s10  ;;  %s2954_s10 = sld [smem:[#allocation9 + $0x38b]] }
 0x18c   : > { %v781_v63 = vmul.f32 %v3519_v40, %v2568_v26  ;;  %v828_v28 = vstv %s2695_s23  ;;  %v3520_v37 = vmov 0.0   ;;  %v2766_v45 = vadd.f32 %v715_v15, %v711_v2  ;;  %3551 = sst [smem:[#allocation52_spill]] %s2946_s5  ;;  %s2950_s23 = sld [smem:[#allocation9 + $0x28b]] }
 0x18d   : > { %909 = vmatprep.mubr.f32.mxu0 %v3520_v37  ;;  %986 = vmatprep.mubr.f32.mxu1 %v3520_v37  ;;  %v3521_v56 = vstv %s2418_s25  ;;  %v777_v13 = vadd.f32 %v2613_v39, %v771_v34  ;;  %v834_v48 = vstv %s2713_s11  ;;  %v2773_v54 = vadd.f32 %v739_v41, %v735_v9  ;;  %s2952_s11 = sld [smem:[#allocation9 + $0x30b]]  ;;  %3556 = sst [smem:[#allocation57_spill]] %s2956_s30 }
 0x18e   : > { %v763_v4 = vmul.f32 %v3521_v56, %v2621_v42  ;;  %v759_v23 = vadd.f32 %v757_v59, %v753_v50  ;;  %v795_v19 = vadd.f32 %v2586_v22, %v2452_v18  ;;  %v805_v10 = vmul.f32 %v804_v0, %v2568_v26  ;;  %1480 = vmatmul.mubr.msk.f32.gmra.mrb[6].mxu0 %vm470_vm0, %v2118_v14  ;;  %3552 = sst [smem:[#allocation53_spill]] %s2948_s0  ;;  %s2962_s5 = sld [smem:[#allocation10 + $0x1]] }
 0x18f   : > { %v783_v15 = vadd.f32 %v781_v63, %v777_v13  ;;  %v3522_v32 = vstv %s2468_s13  ;;  %v819_v39 = vadd.f32 %v2591_v6, %v2461_v5  ;;  %v829_v61 = vmul.f32 %v828_v28, %v2568_v26  ;;  %1482 = vmatmul.mubr.msk.f32.gmra.mrb[6].mxu1 %vm470_vm0, %v2118_v14  ;;  %s2970_s30 = sld [smem:[#allocation10 + $0x3]] }
 0x190   : > { %v787_v3 = vmul.f32 %v3522_v32, %v2621_v42  ;;  %v2790_v18 = vadd.f32 %v763_v4, %v759_v23  ;;  %v801_v22 = vadd.f32 %v2618_v25, %v795_v19  ;;  %v811_v1 = vmul.f32 %v810_v62, %v2621_v42 }
 0x191   : > { %v825_v5 = vadd.f32 %v2626_v8, %v819_v39  ;;  %v652_v26 = vadd.f32 %v2650_v43, %v2536_v31  ;;  %v3523_v6 = vstv %s3491_s21  ;;  %v835_v41 = vmul.f32 %v834_v48, %v2621_v42  ;;  %s2944_s21 = sld [smem:[#allocation9 + $0x10b]]  ;;  %3555 = sst [smem:[#allocation56_spill]] %s2954_s10 }
 0x192   : > { %v2796_v2 = vadd.f32 %v787_v3, %v783_v15  ;;  %v662_v52 = vmul.f32 %v3523_v6, %v2632_v35  ;;  %v807_v14 = vadd.f32 %v805_v10, %v801_v22  ;;  %v676_v25 = vadd.f32 %v2654_v57, %v2538_v30  ;;  %3553 = sst [smem:[#allocation54_spill]] %s2950_s23  ;;  %s2964_s23 = sld [smem:[#allocation10 + $0x2]] }
 0x193   : > { %v3524_v11 = vstv %s2384_s9  ;;  %v831_v34 = vadd.f32 %v829_v61, %v825_v5  ;;  %v658_v8 = vadd.f32 %v2685_v12, %v652_v26  ;;  %v3525_v31 = vstv %s2374_s7  ;;  %s2912_s9 = sld [smem:[#allocation9 + $0x109]]  ;;  %3554 = sst [smem:[#allocation55_spill]] %s2952_s11 }
 0x194   : > { %v686_v59 = vmul.f32 %v3524_v11, %v2632_v35  ;;  %v668_v43 = vmul.f32 %v3525_v31, %v2641_v24  ;;  %v700_v9 = vadd.f32 %v2658_v27, %v2540_v29  ;;  %v2818_v50 = vadd.f32 %v811_v1, %v807_v14  ;;  %v3534_v14 = vld [vmem:[#allocation49_spill] sm:$0xff]  ;;  %s2914_s7 = sld [smem:[#allocation9 + $0x189]]  ;;  %s3593_s10 = sld [smem:[#allocation56_spill]] }
 0x195   : > { %v682_v42 = vadd.f32 %v2689_v44, %v676_v25  ;;  %v3526_v30 = vstv %s2386_s8  ;;  %v3527_v40 = vstv %s2395_s6  ;;  %v2827_v37 = vadd.f32 %v835_v41, %v831_v34  ;;  %s2908_s6 = sld [smem:[#allocation9 + $0x9]] }
 0x196   : > { %v692_v57 = vmul.f32 %v3526_v30, %v2641_v24  ;;  %v710_v63 = vmul.f32 %v3527_v40, %v2632_v35  ;;  %v664_v12 = vadd.f32 %v662_v52, %v658_v8  ;;  %v706_v56 = vadd.f32 %v2693_v58, %v700_v9  ;;  %s2910_s8 = sld [smem:[#allocation9 + $0x89]] }
 0x197   : > { %v724_v29 = vadd.f32 %v2665_v16, %v2545_v21  ;;  %v688_v27 = vadd.f32 %v686_v59, %v682_v42  ;;  %v3528_v44 = vstv %s2397_s24  ;;  %v3529_v13 = vstv %s2403_s28  ;;  %s2904_s28 = sld [smem:[#allocation9 + $0x308]] }
 0x198   : > { %v716_v4 = vmul.f32 %v3528_v44, %v2641_v24  ;;  %v734_v23 = vmul.f32 %v3529_v13, %v2632_v35  ;;  %v748_v19 = vadd.f32 %v2669_v53, %v2547_v55  ;;  %v2840_v10 = vadd.f32 %v668_v43, %v664_v12  ;;  %s2906_s24 = sld [smem:[#allocation9 + $0x388]] }
 0x199   : > { %v712_v15 = vadd.f32 %v710_v63, %v706_v56  ;;  %v730_v58 = vadd.f32 %v2699_v36, %v724_v29  ;;  %v3530_v32 = vstv %s2416_s27  ;;  %v2846_v21 = vadd.f32 %v692_v57, %v688_v27  ;;  %s2900_s27 = sld [smem:[#allocation9 + $0x208]] }
 0x19a   : > { %v758_v16 = vmul.f32 %v3530_v32, %v2632_v35  ;;  %v3531_v3 = vstv %s2405_s22  ;;  %v754_v61 = vadd.f32 %v2703_v46, %v748_v19  ;;  %v772_v55 = vadd.f32 %v2673_v47, %v2549_v33  ;;  %s2902_s22 = sld [smem:[#allocation9 + $0x288]]  ;;  %3545 = sst [smem:[#allocation37_spill]] %s2914_s7 }
 0x19b   : > { %v740_v39 = vmul.f32 %v3531_v3, %v2641_v24  ;;  %v2854_v53 = vadd.f32 %v716_v4, %v712_v15  ;;  %v736_v22 = vadd.f32 %v734_v23, %v730_v58  ;;  %v3532_v1 = vstv %s2418_s25  ;;  %s2898_s25 = sld [smem:[#allocation9 + $0x188]]  ;;  %3543 = sst [smem:[#allocation35_spill]] %s2908_s6 }
 0x19c   : > { %v764_v36 = vmul.f32 %v3532_v1, %v2641_v24  ;;  %v3533_v5 = vstv %s2466_s29  ;;  %v760_v6 = vadd.f32 %v758_v16, %v754_v61  ;;  %v778_v52 = vadd.f32 %v2707_v17, %v772_v55  ;;  %v3536_v17 = vld [vmem:[#allocation50_spill] sm:$0xff]  ;;  %3544 = sst [smem:[#allocation36_spill]] %s2910_s8  ;;  %s2918_s29 = sld [smem:[#allocation9 + $0x289]] }
 0x19d   : > { %v782_v26 = vmul.f32 %v3533_v5, %v2632_v35  ;;  %v796_v46 = vadd.f32 %v2677_v60, %v2554_v49  ;;  %v806_v47 = vmul.f32 %v804_v0, %v2632_v35  ;;  %v2868_v33 = vadd.f32 %v740_v39, %v736_v22  ;;  %3541 = sst [smem:[#allocation33_spill]] %s2904_s28 }
 0x19e   : > { %v820_v41 = vadd.f32 %v3534_v14, %v2556_v38  ;;  %v830_v25 = vmul.f32 %v828_v28, %v2632_v35  ;;  %v2873_v11 = vadd.f32 %v764_v36, %v760_v6  ;;  %v3535_v34 = vstv %s2468_s13  ;;  %3542 = sst [smem:[#allocation34_spill]] %s2906_s24  ;;  %s2916_s13 = sld [smem:[#allocation9 + $0x209]] }
 0x19f   : > { %v784_v59 = vadd.f32 %v782_v26, %v778_v52  ;;  %v788_v8 = vmul.f32 %v3535_v34, %v2641_v24  ;;  %v802_v31 = vadd.f32 %v3536_v17, %v796_v46  ;;  %v812_v43 = vmul.f32 %v810_v62, %v2641_v24  ;;  %3539 = sst [smem:[#allocation31_spill]] %s2900_s27  ;;  %v3573_v34 = vld [vmem:[#allocation41_spill] sm:$0xff] }
 0x1a0   : > { %v826_v60 = vadd.f32 %v2727_v7, %v820_v41  ;;  %v836_v38 = vmul.f32 %v834_v48, %v2641_v24  ;;  %3540 = sst [smem:[#allocation32_spill]] %s2902_s22  ;;  %v1010_v24 = vstv %s2892_s4  ;;  %v1034_v7 = vstv %s2894_s18  ;;  %s3581_s4 = sld [smem:[#allocation53_spill]] }
 0x1a1   : > { %v2880_v49 = vadd.f32 %v788_v8, %v784_v59  ;;  %v808_v0 = vadd.f32 %v806_v47, %v802_v31  ;;  %3538 = sst [smem:[#allocation30_spill]] %s2898_s25  ;;  %v1058_v62 = vstv %s2896_s12  ;;  %v1082_v48 = vstv %s2898_s25  ;;  %s3558_s25 = sld [smem:[#allocation45_spill]] }
 0x1a2   : > { %v832_v9 = vadd.f32 %v830_v25, %v826_v60  ;;  %3550 = sst [smem:[#allocation51_spill]] %s2944_s21  ;;  %v1106_v42 = vstv %s2900_s27  ;;  %v1130_v30 = vstv %s2902_s22  ;;  %v1154_v57 = vstv %s2904_s28  ;;  %s2972_s12 = sld [smem:[#allocation10 + $0x4]] }
 0x1a3   : > { %v2888_v35 = vadd.f32 %v812_v43, %v808_v0  ;;  %v1178_v40 = vstv %s2906_s24  ;;  %v1016_v63 = vstv %s2908_s6  ;;  %v1040_v12 = vstv %s2910_s8  ;;  %s3559_s27 = sld [smem:[#allocation46_spill]]  ;;  %s2978_s22 = sld [smem:[#allocation10 + $0x5]]  ;;  %v3567_v0 = vld [vmem:[#allocation28_spill] sm:$0xff] }
 0x1a4   : > { %v2890_v28 = vadd.f32 %v836_v38, %v832_v9  ;;  %v1064_v56 = vstv %s2912_s9  ;;  %v1088_v29 = vstv %s2914_s7  ;;  %s2980_s28 = sld [smem:[#allocation10 + $0x6]]  ;;  %v1112_v27 = vstv %s2916_s13  ;;  %s2986_s6 = sld [smem:[#allocation10 + $0x7]] }
 0x1a5   : > { %v1136_v44 = vstv %s2918_s29  ;;  %v3405_v4 = vstv %s2920_s1  ;;  %v1184_v13 = vstv %s2922_s2  ;;  %v1022_v23 = vstv %s2924_s3  ;;  %s3564_s7 = sld [smem:[#allocation57_spill]]  ;;  %s3582_s18 = sld [smem:[#allocation54_spill]] }
 0x1a6   : > { %v1046_v19 = vstv %s2926_s15  ;;  %v1070_v15 = vstv %s2928_s16  ;;  %v1094_v58 = vstv %s2930_s17  ;;  %v1118_v32 = vstv %s2932_s19  ;;  %s3588_s24 = sld [smem:[#allocation27_spill]]  ;;  %s3592_s8 = sld [smem:[#allocation55_spill]] }
 0x1a7   : > { %v1142_v16 = vstv %s2934_s20  ;;  %v1166_v3 = vstv %s2936_s26  ;;  %s3579_s26 = sld [smem:[#allocation51_spill]]  ;;  %s3580_s20 = sld [smem:[#allocation52_spill]] }
 0x1a8   : > { %3557 = sst [smem:[#allocation58_spill]] %s2972_s12 }
 0x1a9   : > { %3560 = sst [smem:[#allocation45_spill]] %s2978_s22  ;;  %s3595_s22 = sld [smem:[#allocation58_spill]] }
 0x1aa   : > { %3561 = sst [smem:[#allocation46_spill]] %s2980_s28  ;;  %s3596_s28 = sld [smem:[#allocation45_spill]] }
 0x1ab   : > { %s3602_s12 = sld [smem:[#allocation46_spill]] }
 0x1ac   : > { %s1405_s21 = sshll.u32 %s3588_s24, 7  ;;  %s3626_s15 = sld [smem:[#allocation63_spill]] }
 0x1ad   : > { %s3170_s9 = scalar_lea.vmem [#allocation11], %s1405_s21  ;;  %s1257_s17 = scalar_lea.sflag [#allocation4], %s3588_s24 }
 0x25c   : > { %v905_v36 = vpop.f32.mrb[4].mxu0 }
 0x25d   : > { %v982_v5 = vpop.f32.mrb[4].mxu1  ;;  %v993_v47 = vmul.f32 0.95, %v905_v36  ;;  %v907_v14 = vpop.f32.mrb[5].mxu0 }
 0x25e   : > { %v995_v41 = vmul.f32 0.95, %v982_v5  ;;  %v984_v25 = vpop.f32.mrb[5].mxu1  ;;  %v994_v8 = vmul.f32 0.95, %v907_v14  ;;  %v3571_v5 = vld [vmem:[#allocation40_spill] sm:$0xff] }
 0x25f   : > { %v996_v17 = vmul.f32 0.95, %v984_v25  ;;  %v1001_v43 = vadd.f32 %v993_v47, %v3567_v0  ;;  %v3574_v14 = vld [vmem:[#allocation42_spill] sm:$0xff] }
 0x260   : > { %v1002_v59 = vadd.f32 %v994_v8, %v3571_v5  ;;  %v3014_v52 = vadd.f32 %v995_v41, %v3573_v34 }
 0x261   : > { %v911_v46 = vpop.f32.mrb[6].mxu0  ;;  %v3017_v25 = vadd.f32 %v996_v17, %v3574_v14  ;;  %v1011_v47 = vmul.f32 %v1010_v24, %v1001_v43  ;;  %v1035_v0 = vmul.f32 %v1034_v7, %v1001_v43  ;;  %v1059_v38 = vmul.f32 %v1058_v62, %v1001_v43 }
 0x262   : > { %v3020_v60 = vpop.f32.mrb[6].mxu1  ;;  %v1083_v36 = vmul.f32 %v1082_v48, %v1001_v43  ;;  %v3030_v8 = vpop.f32.mrb[7].mxu0  ;;  %v1107_v34 = vmul.f32 %v1106_v42, %v1001_v43  ;;  %v1131_v17 = vmul.f32 %v1130_v30, %v1001_v43  ;;  %v1155_v5 = vmul.f32 %v1154_v57, %v1001_v43 }
 0x263   : > { %v3032_v41 = vpop.f32.mrb[7].mxu1  ;;  %v1179_v14 = vmul.f32 %v1178_v40, %v1001_v43  ;;  %v1013_v31 = vadd.f32 %v1011_v47, %v2734_v51  ;;  %v1037_v9 = vadd.f32 %v1035_v0, %v2736_v20  ;;  %v1061_v6 = vadd.f32 %v1059_v38, %v2766_v45 }
 0x264   : > { %v1085_v26 = vadd.f32 %v1083_v36, %v2773_v54  ;;  %v1109_v1 = vadd.f32 %v1107_v34, %v2790_v18  ;;  %v1133_v22 = vadd.f32 %v1131_v17, %v2796_v2  ;;  %v1157_v55 = vadd.f32 %v1155_v5, %v2818_v50 }
 0x265   : > { %v1181_v61 = vadd.f32 %v1179_v14, %v2827_v37  ;;  %v1017_v39 = vmul.f32 %v1016_v63, %v1002_v59  ;;  %v1041_v43 = vmul.f32 %v1040_v12, %v1002_v59  ;;  %v1065_v51 = vmul.f32 %v1064_v56, %v1002_v59 }
 0x266   : > { %v1089_v20 = vmul.f32 %v1088_v29, %v1002_v59  ;;  %v1113_v45 = vmul.f32 %v1112_v27, %v1002_v59  ;;  %v1137_v54 = vmul.f32 %v1136_v44, %v1002_v59  ;;  %v1161_v18 = vmul.f32 %v3405_v4, %v1002_v59 }
 0x267   : > { %v1185_v2 = vmul.f32 %v1184_v13, %v1002_v59  ;;  %v1019_v50 = vadd.f32 %v1017_v39, %v1013_v31  ;;  %v1043_v37 = vadd.f32 %v1041_v43, %v1037_v9  ;;  %v1067_v38 = vadd.f32 %v1065_v51, %v1061_v6 }
 0x268   : > { %v1091_v36 = vadd.f32 %v1089_v20, %v1085_v26  ;;  %v1115_v47 = vadd.f32 %v1113_v45, %v1109_v1  ;;  %v1139_v0 = vadd.f32 %v1137_v54, %v1133_v22  ;;  %v1163_v34 = vadd.f32 %v1161_v18, %v1157_v55  ;;  %v3578_v26 = vld [vmem:[#allocation43_spill] sm:$0xff] }
 0x269   : > { %v1187_v17 = vadd.f32 %v1185_v2, %v1181_v61  ;;  %v997_v5 = vmul.f32 0.95, %v911_v46  ;;  %v1023_v14 = vmul.f32 %v1022_v23, %v3014_v52  ;;  %v1047_v4 = vmul.f32 %v1046_v19, %v3014_v52 }
 0x26a   : > { %v1071_v39 = vmul.f32 %v1070_v15, %v3014_v52  ;;  %v1095_v1 = vmul.f32 %v1094_v58, %v3014_v52  ;;  %v1119_v61 = vmul.f32 %v1118_v32, %v3014_v52  ;;  %v1143_v55 = vmul.f32 %v1142_v16, %v3014_v52 }
 0x26b   : > { %v1167_v22 = vmul.f32 %v1166_v3, %v3014_v52  ;;  %v1005_v6 = vadd.f32 %v997_v5, %v3578_v26  ;;  %v1025_v46 = vadd.f32 %v1023_v14, %v1019_v50  ;;  %v1049_v59 = vadd.f32 %v1047_v4, %v1043_v37 }
 0x26c   : > { %v1073_v31 = vadd.f32 %v1071_v39, %v1067_v38  ;;  %v1097_v9 = vadd.f32 %v1095_v1, %v1091_v36  ;;  %v1121_v43 = vadd.f32 %v1119_v61, %v1115_v47  ;;  %v1145_v51 = vadd.f32 %v1143_v55, %v1139_v0  ;;  %v3591_v39 = vld [vmem:[#allocation47_spill] sm:$0xff] }
 0x26d   : > { %v1169_v20 = vadd.f32 %v1167_v22, %v1163_v34  ;;  %v1012_v45 = vmul.f32 %v1010_v24, %v1005_v6  ;;  %v1036_v54 = vmul.f32 %v1034_v7, %v1005_v6  ;;  %v1060_v18 = vmul.f32 %v1058_v62, %v1005_v6 }
 0x26e   : > { %v1084_v2 = vmul.f32 %v1082_v48, %v1005_v6  ;;  %v1108_v5 = vmul.f32 %v1106_v42, %v1005_v6  ;;  %v1132_v4 = vmul.f32 %v1130_v30, %v1005_v6  ;;  %v1156_v50 = vmul.f32 %v1154_v57, %v1005_v6 }
 0x26f   : > { %v1180_v24 = vmul.f32 %v1178_v40, %v1005_v6  ;;  %v1014_v7 = vadd.f32 %v1012_v45, %v2840_v10  ;;  %v1038_v62 = vadd.f32 %v1036_v54, %v2846_v21  ;;  %v1062_v37 = vadd.f32 %v1060_v18, %v2854_v53 }
 0x270   : > { %v1086_v48 = vadd.f32 %v1084_v2, %v2868_v33  ;;  %v1110_v42 = vadd.f32 %v1108_v5, %v2873_v11  ;;  %v1134_v38 = vadd.f32 %v1132_v4, %v2880_v49  ;;  %v1158_v30 = vadd.f32 %v1156_v50, %v2888_v35 }
 0x271   : > { %v1182_v57 = vadd.f32 %v1180_v24, %v2890_v28  ;;  %v3583_v36 = vstv %s3558_s25  ;;  %v998_v10 = vmul.f32 0.95, %v3030_v8  ;;  %v3584_v21 = vstv %s3559_s27 }
 0x272   : > { %v1191_v40 = vmul.f32 %v3583_v36, %v3014_v52  ;;  %v1029_v53 = vmul.f32 %v3584_v21, %v3017_v25  ;;  %v3585_v33 = vstv %s2942_s14  ;;  %v3586_v49 = vstv %s3579_s26 }
 0x273   : > { %v1053_v11 = vmul.f32 %v3585_v33, %v3017_v25  ;;  %v1077_v35 = vmul.f32 %v3586_v49, %v3017_v25  ;;  %v3587_v28 = vstv %s3580_s20  ;;  %v3589_v52 = vstv %s3581_s4 }
 0x274   : > { %v1101_v47 = vmul.f32 %v3587_v28, %v3017_v25  ;;  %v1125_v8 = vmul.f32 %v3589_v52, %v3017_v25  ;;  %v3590_v0 = vstv %s3582_s18  ;;  %v1193_v14 = vadd.f32 %v1191_v40, %v1187_v17 }
 0x275   : > { %v1149_v34 = vmul.f32 %v3590_v0, %v3017_v25  ;;  %v1006_v1 = vadd.f32 %v998_v10, %v3591_v39  ;;  %v1031_v61 = vadd.f32 %v1029_v53, %v1025_v46  ;;  %v1055_v55 = vadd.f32 %v1053_v11, %v1049_v59 }
 0x276   : > { %v1079_v22 = vadd.f32 %v1077_v35, %v1073_v31  ;;  %v1103_v26 = vadd.f32 %v1101_v47, %v1097_v9  ;;  %v1127_v6 = vadd.f32 %v1125_v8, %v1121_v43  ;;  %v3594_v59 = vstv %s2920_s1  ;;  %v3610_v47 = vld [vmem:[#allocation44_spill] sm:$0xff]  ;;  %v3611_v8 = vld [vmem:[#allocation48_spill] sm:$0xff]  ;;  %s3613_s1 = sld [smem:[#allocation20_spill]] }
 0x277   : > { %v1151_v45 = vadd.f32 %v1149_v34, %v1145_v51  ;;  %v1018_v54 = vmul.f32 %v1016_v63, %v1006_v1  ;;  %v1042_v18 = vmul.f32 %v1040_v12, %v1006_v1  ;;  %v1066_v2 = vmul.f32 %v1064_v56, %v1006_v1 }
 0x278   : > { %v1090_v5 = vmul.f32 %v1088_v29, %v1006_v1  ;;  %v1114_v17 = vmul.f32 %v1112_v27, %v1006_v1  ;;  %v1138_v46 = vmul.f32 %v1136_v44, %v1006_v1  ;;  %v1162_v31 = vmul.f32 %v3594_v59, %v1006_v1 }
 0x279   : > { %v1186_v63 = vmul.f32 %v1184_v13, %v1006_v1  ;;  %v1020_v12 = vadd.f32 %v1018_v54, %v1014_v7  ;;  %v1044_v56 = vadd.f32 %v1042_v18, %v1038_v62  ;;  %v1068_v9 = vadd.f32 %v1066_v2, %v1062_v37 }
 0x27a   : > { %v1092_v43 = vadd.f32 %v1090_v5, %v1086_v48  ;;  %v1116_v29 = vadd.f32 %v1114_v17, %v1110_v42  ;;  %v1140_v51 = vadd.f32 %v1138_v46, %v1134_v38  ;;  %v1164_v4 = vadd.f32 %v1162_v31, %v1158_v30 }
 0x27b   : > { %v1188_v50 = vadd.f32 %v1186_v63, %v1182_v57  ;;  %v3597_v27 = vstv %s3592_s8  ;;  %v3598_v44 = vstv %s3593_s10  ;;  %v3599_v40 = vstv %s3564_s7 }
 0x27c   : > { %v1173_v24 = vmul.f32 %v3597_v27, %v3017_v25  ;;  %v1197_v36 = vmul.f32 %v3598_v44, %v3017_v25  ;;  %v1203_v10 = vadd.f32 %v3599_v40, %v1031_v61  ;;  %v3600_v21 = vstv %s2962_s5 }
 0x27d   : > { %v1209_v53 = vadd.f32 %v3600_v21, %v1055_v55  ;;  %v3601_v13 = vstv %s2964_s23  ;;  %v3603_v62 = vstv %s2970_s30  ;;  %v3604_v48 = vstv %s3595_s22 }
 0x27e   : > { %v1216_v7 = vadd.f32 %v3601_v13, %v1079_v22  ;;  %v1223_v37 = vadd.f32 %v3603_v62, %v1103_v26  ;;  %v1230_v42 = vadd.f32 %v3604_v48, %v1127_v6  ;;  %v3605_v38 = vstv %s3596_s28  ;;  %1205 = vst [vmem:[%s3170_s9] sm:$0xff] %v1203_v10 }
 0x27f   : > { %v1237_v30 = vadd.f32 %v3605_v38, %v1151_v45  ;;  %v1175_v57 = vadd.f32 %v1173_v24, %v1169_v20  ;;  %v1199_v33 = vadd.f32 %v1197_v36, %v1193_v14  ;;  %1516 = vst [vmem:[%s3170_s9 + $0x10] sm:$0xff] %v1209_v53  ;;  %v999_v25 = vmul.f32 0.95, %v3020_v60 }
 0x280   : > { %v1000_v20 = vmul.f32 0.95, %v3032_v41  ;;  %1519 = vst [vmem:[%s3170_s9 + $0x20] sm:$0xff] %v1216_v7  ;;  %1522 = vst [vmem:[%s3170_s9 + $0x30] sm:$0xff] %v1223_v37  ;;  %v3608_v11 = vstv %s3602_s12  ;;  %v3609_v35 = vstv %s2986_s6 }
 0x281   : > { %1525 = vst [vmem:[%s3170_s9 + $0x40] sm:$0xff] %v1230_v42  ;;  %1528 = vst [vmem:[%s3170_s9 + $0x50] sm:$0xff] %v1237_v30  ;;  %v1244_v49 = vadd.f32 %v3608_v11, %v1175_v57  ;;  %v1251_v28 = vadd.f32 %v3609_v35, %v1199_v33  ;;  %v1007_v52 = vadd.f32 %v999_v25, %v3610_v47  ;;  %v3612_v55 = vstv %s3558_s25  ;;  %s1542_s25 = sshll.u32 %s3613_s1, 11 }
 0x282   : > { %v1008_v0 = vadd.f32 %v1000_v20, %v3611_v8  ;;  %v3614_v54 = vstv %s3559_s27  ;;  %v3616_v5 = vstv %s3579_s26  ;;  %v3617_v17 = vstv %s3580_s20  ;;  %s1271_s27 = sshll.u32 %s3170_s9, 4  ;;  %s3627_s26 = smov %s3626_s15  ;;  %s3235_s27 = int_to_ptr.vmem [resolvable:$true] %s1271_s27 }
 0x283   : > { %1531 = vst [vmem:[%s3170_s9 + $0x60] sm:$0xff] %v1244_v49  ;;  %1534 = vst [vmem:[%s3170_s9 + $0x70] sm:$0xff] %v1251_v28  ;;  %v1024_v60 = vmul.f32 %v1022_v23, %v1007_v52  ;;  %v1048_v41 = vmul.f32 %v1046_v19, %v1007_v52  ;;  %v1072_v34 = vmul.f32 %v1070_v15, %v1007_v52  ;;  %v3618_v59 = vstv %s3581_s4  ;;  %s3233_s16 = scalar_lea.hbm %s3626_s15, %s1542_s25  ;;  %s1743_s19 = scalar_lea.vmem %s3235_s27, 2048 }
 0x284   : > { %v1096_v14 = vmul.f32 %v1094_v58, %v1007_v52  ;;  %v1120_v39 = vmul.f32 %v1118_v32, %v1007_v52  ;;  %v1144_v1 = vmul.f32 %v1142_v16, %v1007_v52  ;;  %v1168_v61 = vmul.f32 %v1166_v3, %v1007_v52  ;;  %p1744_p11 = scmp.ne.s32.totalorder %s3235_s27, %s1743_s19  ;;  %s1846_s20 = smov [#allocation11]  }
 0x285   : > { %v1192_v23 = vmul.f32 %v3612_v55, %v1007_v52  ;;  %v1026_v19 = vadd.f32 %v1024_v60, %v1020_v12  ;;  %v1050_v22 = vadd.f32 %v1048_v41, %v1044_v56  ;;  %v1074_v15 = vadd.f32 %v1072_v34, %v1068_v9 }
 0x286   : > { %v1098_v26 = vadd.f32 %v1096_v14, %v1092_v43  ;;  %v1122_v58 = vadd.f32 %v1120_v39, %v1116_v29  ;;  %v1146_v6 = vadd.f32 %v1144_v1, %v1140_v51  ;;  %v1170_v45 = vadd.f32 %v1168_v61, %v1164_v4  ;;  %p1745_p4 = pnand %p1744_p11, %p2005_p6 }
 0x287   : > { %v1194_v32 = vadd.f32 %v1192_v23, %v1188_v50  ;;  %v1030_v18 = vmul.f32 %v3614_v54, %v1008_v0  ;;  %v3615_v16 = vstv %s2942_s14  ;;  %v1078_v3 = vmul.f32 %v3616_v5, %v1008_v0 }
 0x288   : > { %v1054_v2 = vmul.f32 %v3615_v16, %v1008_v0  ;;  %v1102_v46 = vmul.f32 %v3617_v17, %v1008_v0  ;;  %v1126_v31 = vmul.f32 %v3618_v59, %v1008_v0  ;;  %v3619_v63 = vstv %s3582_s18  ;;  %p1746_p8 = pneg %p1745_p4 }
 0x289   : > { %v1150_v12 = vmul.f32 %v3619_v63, %v1008_v0  ;;  %v3620_v56 = vmov %v3597_v27  ;;  %v3621_v43 = vmov %v3598_v44  ;;  %v1032_v51 = vadd.f32 %v1030_v18, %v1026_v19 }
 0x28a   : > { %v1174_v9 = vmul.f32 %v3620_v56, %v1008_v0  ;;  %v1198_v29 = vmul.f32 %v3621_v43, %v1008_v0  ;;  %v1056_v4 = vadd.f32 %v1054_v2, %v1050_v22  ;;  %v1080_v50 = vadd.f32 %v1078_v3, %v1074_v15 }
 0x28b   : > { %v1104_v27 = vadd.f32 %v1102_v46, %v1098_v26  ;;  %v1128_v24 = vadd.f32 %v1126_v31, %v1122_v58  ;;  %v1152_v44 = vadd.f32 %v1150_v12, %v1146_v6  ;;  %v3622_v10 = vstv %s3564_s7 }
 0x28c   : > { %v1176_v36 = vadd.f32 %v1174_v9, %v1170_v45  ;;  %v1200_v40 = vadd.f32 %v1198_v29, %v1194_v32  ;;  %v1204_v21 = vadd.f32 %v3622_v10, %v1032_v51  ;;  %v3623_v53 = vstv %s2962_s5 }
 0x28d   : > { %v1210_v13 = vadd.f32 %v3623_v53, %v1056_v4  ;;  %v3624_v7 = vstv %s2964_s23  ;;  %v3625_v37 = vstv %s2970_s30  ;;  %v3628_v42 = vstv %s3595_s22  ;;  %s1747_s30 = sshll.u32 %s1846_s20, 4  ;;  %s1748_s30 = int_to_ptr.vmem [resolvable:$false] %s1747_s30 }
 0x28e   : > { %v1217_v62 = vadd.f32 %v3624_v7, %v1080_v50  ;;  %v1224_v48 = vadd.f32 %v3625_v37, %v1104_v27  ;;  %v1231_v38 = vadd.f32 %v3628_v42, %v1128_v24  ;;  %v3630_v30 = vstv %s3596_s28  ;;  %1206 = vst [vmem:[%s3170_s9 + $0x8] sm:$0xff] %v1204_v21  ;;  %s1749_s6 = scalar_lea.vmem %s1748_s30, 4096  ;;  %p1750_p10 = scmp.lt.s32.totalorder %s3235_s27, %s1748_s30 }
 0x28f   : > { %v1238_v57 = vadd.f32 %v3630_v30, %v1152_v44  ;;  %v3631_v33 = vmov %v3608_v11  ;;  %v3632_v20 = vmov %v3609_v35  ;;  %1517 = vst [vmem:[%s3170_s9 + $0x18] sm:$0xff] %v1210_v13  ;;  %p1751_p12 = scmp.lt.s32.totalorder %s1749_s6, %s1743_s19 }
 0x290   : > { %v1245_v25 = vadd.f32 %v3631_v33, %v1176_v36  ;;  %v1252_v11 = vadd.f32 %v3632_v20, %v1200_v40  ;;  %1520 = vst [vmem:[%s3170_s9 + $0x28] sm:$0xff] %v1217_v62  ;;  %1523 = vst [vmem:[%s3170_s9 + $0x38] sm:$0xff] %v1224_v48 }
 0x291   : > { %1526 = vst [vmem:[%s3170_s9 + $0x48] sm:$0xff] %v1231_v38  ;;  %1529 = vst [vmem:[%s3170_s9 + $0x58] sm:$0xff] %v1238_v57  ;;  %p1752_p0 = por %p1751_p12, %p1750_p10 }
 0x292   : > { %1532 = vst [vmem:[%s3170_s9 + $0x68] sm:$0xff] %v1245_v25  ;;  %1535 = vst [vmem:[%s3170_s9 + $0x78] sm:$0xff] %v1252_v11 }
 0x293   : > { %p1753_p5 = pnand %p1752_p0, %p1746_p8 }
 0x295   : > { %1756 = shalt.err (!%p1753_p5)
}
 0x296   : > { %s1757_s14 = scalar_lea.hbm %s3233_s16, 2048  ;;  %s1761_s23 = scalar_lea.hbm %s3627_s26, 4096 }
 0x297   : > { %p1758_p9 = scmp.ne.s32.totalorder %s3233_s16, %s1757_s14  ;;  %p1762_p3 = scmp.lt.u32.totalorder %s3233_s16, %s3627_s26 }
 0x298   : > { %p1763_p7 = scmp.lt.u32.totalorder %s1761_s23, %s1757_s14  ;;  %p1765_p11 = scmp.lt.u32.totalorder %s1757_s14, %s3233_s16 }
 0x299   : > { %p1759_p13 = pnand %p1758_p9, %p2005_p6 }
 0x29a   : > { %p1764_p2 = por %p1763_p7, %p1762_p3 }
 0x29b   : > { %p1760_p1 = pneg %p1759_p13 }
 0x29c   : > { %p1766_p4 = por %p1765_p11, %p1764_p2 }
 0x29e   : > { %p1767_p8 = pnand %p1766_p4, %p1760_p1 }
 0x2a0   : > { %1770 = shalt.err (!%p1767_p8)
}
 0x2a1   : > { %s1847_s18 = smov 128   ;;  %s1848_s8 = smov 8  }
 0x2a2   : > { %1573 = dma.vmem_to_hbm [thread:$0]  (%p2005_p6), %s3235_s27, 2048, %s3233_s16, %s1257_s17, %s1847_s18, %s1847_s18, %s1848_s8  }
 0x2a3 PF: > { %s3633_s10 = sld [smem:[#allocation17_spill]]  ;;  %s3634_s21 = sld [smem:[#allocation23_spill]] }
 0x2a4   : > { %s3635_s22 = sld [smem:[#allocation22_spill]] }
 0x2a9   : > { %s1286_s28 = sand.u32 1, %s3633_s10   ;;  %p3636_p10 = scmp.ne.s32.totalorder %s3634_s21, 0 }
 0x2aa   : > { %p3637_p12 = scmp.ge.s32.totalorder %s3635_s22, 2  ;;  %s1287_s12 = scalar_lea.sflag [#allocation4], %s1286_s28 }
 0x2ac   : > { %p1590_p0 = pnand %p3637_p12, %p3636_p10 }
 0x2ae   : > { %1812 = dma.done.wait (!%p1590_p0), %s1287_s12, 2048  }
 0x2af   : > { %1814 = vsyncadd (!%p1590_p0), %s1287_s12, 4294965248  ;;  %s23_s20 = sadd.s32 1, %s3635_s22   ;;  %s3638_s15 = sld [smem:[#allocation18_spill]] }
 0x2b0   : > { %p20_p5 = scmp.ge.s32.totalorder %s23_s20, 4   ;;  %s3639_s16 = sld [smem:[#allocation19_spill]] }
 0x2b1   : > { %s3640_s17 = sld [smem:[#allocation26_spill]]  ;;  %s3641_s18 = sld [smem:[#allocation21_spill]] }
 0x2b2   : > { %s3642_s19 = sld [smem:[#allocation25_spill]]  ;;  %22 = sbr.rel (!%p20_p5) target bundleno = 15 (0xf), region = 105 }
 0x2b9   :  { %1292 = vsyncpa [#allocation3], 1 }
 0x2ba   :  { %1294 = vsyncpa [#allocation3 + $0x1], 1 }
 0x2bb   :  { %1295 = vsyncpa [#allocation8], 1 }
 0x2bc   :  { %1296 = vsyncpa [#allocation4], 1 }
 0x2bd   :  { %1298 = vsyncpa [#allocation4 + $0x1], 1 }
 0x2be   :  { %1299 = vsyncpa [#allocation5], 1 }
 0x2bf   :  { %1301 = vsyncpa [#allocation5 + $0x1], 1 }
 0x2c0   :  { %1302 = vsyncpa [#allocation6], 1 }
 0x2c1   :  { %1304 = vsyncpa [#allocation6 + $0x1], 1 }

</bundles_post_ra>
